<compile_context>
chip_gen: v7x
topology: tpu7x:2x2x1
jax: 0.10.0
libtpu: 0.0.40
codegen_flags: <defaults>
</compile_context>

<pallas_src>
import functools

import jax
import jax.numpy as jnp
from jax import lax
from jax.experimental import pallas as pl
from jax.experimental.pallas import tpu as pltpu


# tap order: t = (dy+1)*3 + (dx+1)  (matches torch weight [.., di, dj] order)
_OFFS = tuple((dy, dx) for dy in (-1, 0, 1) for dx in (-1, 0, 1))


# ------------------------------ fused kernel --------------------------------

def _fused_resnet_kernel(x_ref, m16_ref, sel_ref, s8_ref,
                         w1_ref, b1_ref,
                         w11_ref, b11_ref, w12_ref, b12_ref,
                         w21_ref, b21_ref, w22_ref, b22_ref,
                         wd_ref, bd_ref, fcw_ref, fcb_ref,
                         o_ref, *, H, W):
    f32 = jnp.float32
    HW = H * W
    m16 = m16_ref[...]                                  # (9, H*W) boundary masks

    def conv3x3(x, wt_ref):
        # 3x3 / stride-1 / pad-1 conv on a (C_in, H*W) activation (HW = 256,
        # a multiple of 128, so lane rolls are cheap XLU rotations).
        # wt_ref: (9, C_out, C_in) with the BN scale pre-folded.
        c_out = wt_ref.shape[1]
        acc = jnp.zeros((c_out, HW), f32)
        for t, (dy, dx) in enumerate(_OFFS):
            shift = (-(dy * W + dx)) % HW               # out[p] = in[p + dy*W + dx]
            xs = pltpu.roll(x, shift=shift, axis=1) if shift else x
            if (dy, dx) != (0, 0):
                xs = xs * m16[t:t + 1, :]               # zero the wrapped lanes
            acc = acc + jnp.dot(wt_ref[t], xs, preferred_element_type=f32)
        return acc

    x0 = x_ref[...]                                     # (8, 256) ch-padded input

    # conv1 + bn1 + relu
    h = jnp.maximum(conv3x3(x0, w1_ref) + b1_ref[...], 0.0)            # (8, 256)

    # layer1 BasicBlock (identity shortcut)
    r = h
    h = jnp.maximum(conv3x3(h, w11_ref) + b11_ref[...], 0.0)
    h = jnp.maximum(conv3x3(h, w12_ref) + b12_ref[...] + r, 0.0)       # (8, 256)

    # layer2 BasicBlock (stride 2, 1x1 projection shortcut).  Stride-2 convs
    # are computed at full resolution and subsampled with the 0/1 selection
    # matrix `sel` on the MXU; bias is added after the subsample.
    sel = sel_ref[...]                                  # (256, 64)
    r = jnp.dot(jnp.dot(wd_ref[...], h, preferred_element_type=f32), sel,
                preferred_element_type=f32) + bd_ref[...]              # (16, 64)
    h = jnp.dot(conv3x3(h, w21_ref), sel,
                preferred_element_type=f32) + b21_ref[...]
    h = jnp.maximum(h, 0.0)                             # (16, 64)

    # layer2 conv2: 3x3 / s1 / p1 on the 8x8 map.  Lane width is 64 (< 128),
    # so spatial shifts use tiny precomputed 64x64 shift-and-mask matrices
    # (pure MXU matmuls) instead of lane rolls.
    acc = jnp.zeros_like(h)
    for t in range(9):
        xs = jnp.dot(h, s8_ref[t], preferred_element_type=f32)         # (16, 64)
        acc = acc + jnp.dot(w22_ref[t], xs, preferred_element_type=f32)
    h = jnp.maximum(acc + b22_ref[...] + r, 0.0)        # (16, 64)

    # second_part_conv = AdaptiveAvgPool2d((1,1)); forward() then applies
    # F.adaptive_avg_pool2d(x, (1,1)) again, which is the identity here.
    feat = jnp.mean(h, axis=1, keepdims=True)           # (16, 1)
    # x.view((1,-1)) + fc  ->  logits as a (num_classes, 1) column
    o_ref[...] = jnp.dot(fcw_ref[...], feat,
                         preferred_element_type=f32) + fcb_ref[...]


# --------------------------- host-side preparation --------------------------

def _bn_fold(w, bn, eps=1e-5):
    """Fold eval-mode BatchNorm2d into the conv weight + a per-channel bias."""
    scale = bn["gamma"] / jnp.sqrt(bn["var"] + eps)
    bias = bn["beta"] - bn["mean"] * scale
    return w * scale[:, None, None, None], bias


def _tap_weights(w):
    """(C_out, C_in, 3, 3) torch layout -> (9, C_out, C_in), tap t = di*3+dj."""
    c_out, c_in = w.shape[0], w.shape[1]
    return jnp.transpose(w, (2, 3, 0, 1)).reshape(9, c_out, c_in)


def _boundary_masks(H, W):
    """(9, H*W) 0/1 masks: mask[t, y*W+x] = 1 iff (y+dy, x+dx) is in bounds."""
    y = jnp.arange(H)[:, None]
    x = jnp.arange(W)[None, :]
    rows = []
    for dy, dx in _OFFS:
        ok = (y + dy >= 0) & (y + dy < H) & (x + dx >= 0) & (x + dx < W)
        rows.append(ok.reshape(-1))
    return jnp.stack(rows, axis=0).astype(jnp.float32)


def _stride2_selection(H, W):
    """(H*W, (H//2)*(W//2)) 0/1 matrix selecting spatial positions (2yo, 2xo)."""
    Ho, Wo = H // 2, W // 2
    src = (2 * jnp.arange(Ho)[:, None] * W
           + 2 * jnp.arange(Wo)[None, :]).reshape(-1)
    return (jnp.arange(H * W)[:, None] == src[None, :]).astype(jnp.float32)


def _shift_matrices(H, W):
    """(9, H*W, H*W): (x @ T[t]) shifts a (C, H*W) map by (dy, dx), zero-padded."""
    HW = H * W
    yy = jnp.broadcast_to(jnp.arange(H)[:, None], (H, W))
    xx = jnp.broadcast_to(jnp.arange(W)[None, :], (H, W))
    mats = []
    for dy, dx in _OFFS:
        ys, xs = yy + dy, xx + dx
        valid = ((ys >= 0) & (ys < H) & (xs >= 0) & (xs < W)).reshape(-1)
        src = (ys * W + xs).reshape(-1)
        t = (jnp.arange(HW)[:, None] == src[None, :]) & valid[None, :]
        mats.append(t.astype(jnp.float32))
    return jnp.stack(mats, axis=0)


def resnet_cam_forward(params, x, *, eps=1e-5):
    """ResNet_CAM(net, layer_k=-1) eval-mode forward.  x: (1, C, H, W) f32."""
    p = params
    N, C_in, H, W = x.shape
    if N != 1:
        raise ValueError("ResNet_CAM.forward hard-codes batch size 1")
    # TODO(synk): x.register_hook(self.activations_hook) is a backward-only
    # hook (stores the activation gradient); it has no forward-pass effect.

    # ---- constant index helpers (folded to compile-time constants) ---------
    m16 = _boundary_masks(H, W)                 # (9, 256)
    sel = _stride2_selection(H, W)              # (256, 64)
    s8 = _shift_matrices(H // 2, W // 2)        # (9, 64, 64)

    # ---- parameter prep: fold BN into weights, tap-major 3-D layout --------
    w1, b1 = _bn_fold(p["conv1_w"], p["bn1"], eps)
    c_pad = (-C_in) % 8                          # conv1 C_in 4 -> 8 (sublane align)
    w1 = jnp.pad(w1, ((0, 0), (0, c_pad), (0, 0), (0, 0)))
    w11, b11 = _bn_fold(p["l1_conv1_w"], p["l1_bn1"], eps)
    w12, b12 = _bn_fold(p["l1_conv2_w"], p["l1_bn2"], eps)
    w21, b21 = _bn_fold(p["l2_conv1_w"], p["l2_bn1"], eps)
    w22, b22 = _bn_fold(p["l2_conv2_w"], p["l2_bn2"], eps)
    wd, bd = _bn_fold(p["l2_down_w"], p["l2_down_bn"], eps)

    x0 = jnp.pad(x.reshape(C_in, H * W), ((0, c_pad), (0, 0)))   # (8, 256)
    col = lambda b: b.reshape(-1, 1)
    nc = p["fc_w"].shape[0]

    operands = (
        x0, m16, sel, s8,
        _tap_weights(w1), col(b1),
        _tap_weights(w11), col(b11),
        _tap_weights(w12), col(b12),
        _tap_weights(w21), col(b21),
        _tap_weights(w22), col(b22),
        wd.reshape(wd.shape[0], wd.shape[1]), col(bd),
        p["fc_w"], col(p["fc_b"]),
    )
    bytes_accessed = 4 * (sum(int(op.size) for op in operands) + nc)

    kernel = functools.partial(_fused_resnet_kernel, H=H, W=W)
    logits = pl.pallas_call(
        kernel,
        out_shape=jax.ShapeDtypeStruct((nc, 1), jnp.float32),
        in_specs=[pl.BlockSpec(memory_space=pltpu.MemorySpace.VMEM)]
        * len(operands),
        out_specs=pl.BlockSpec(memory_space=pltpu.MemorySpace.VMEM),
        cost_estimate=pl.CostEstimate(flops=4_100_000, transcendentals=0,
                                      bytes_accessed=bytes_accessed),
    )(*operands)
    return logits.reshape(1, nc)                 # x.view((1, -1)) -> fc output


# ------------------------------- parameters ---------------------------------

def init_params(key):
    ks = jax.random.split(key, 32)
    it = iter(ks)

    def conv_w(cout, cin, k):
        std = (2.0 / (cin * k * k)) ** 0.5
        return std * jax.random.normal(next(it), (cout, cin, k, k), jnp.float32)

    def bn(c):
        return dict(
            gamma=1.0 + 0.1 * jax.random.normal(next(it), (c,), jnp.float32),
            beta=0.1 * jax.random.normal(next(it), (c,), jnp.float32),
            mean=0.1 * jax.random.normal(next(it), (c,), jnp.float32),
            var=1.0 + 0.1 * jax.random.uniform(next(it), (c,), jnp.float32),
        )

    p = {}
    p["conv1_w"] = conv_w(8, 4, 3);   p["bn1"] = bn(8)
    # layer1 BasicBlock (8 -> 8, stride 1, identity skip)
    p["l1_conv1_w"] = conv_w(8, 8, 3);   p["l1_bn1"] = bn(8)
    p["l1_conv2_w"] = conv_w(8, 8, 3);   p["l1_bn2"] = bn(8)
    # layer2 BasicBlock (8 -> 16, stride 2, 1x1 conv downsample)
    p["l2_conv1_w"] = conv_w(16, 8, 3);  p["l2_bn1"] = bn(16)
    p["l2_conv2_w"] = conv_w(16, 16, 3); p["l2_bn2"] = bn(16)
    p["l2_down_w"] = conv_w(16, 8, 1);   p["l2_down_bn"] = bn(16)
    # fc: 16 features -> 10 classes
    p["fc_w"] = 0.1 * jax.random.normal(next(it), (10, 16), jnp.float32)
    p["fc_b"] = 0.01 * jax.random.normal(next(it), (10,), jnp.float32)
    return p


# --------------------------- pure-JAX reference ------------------------------

def _conv_bn_ref(x, w, bn, stride, pad, relu, residual=None, eps=1e-5):
    y = lax.conv_general_dilated(
        x, w, window_strides=(stride, stride),
        padding=((pad, pad), (pad, pad)),
        dimension_numbers=("NCHW", "OIHW", "NCHW"),
        precision=lax.Precision.HIGHEST)
    scale = bn["gamma"] / jnp.sqrt(bn["var"] + eps)
    bias = bn["beta"] - bn["mean"] * scale
    y = y * scale[None, :, None, None] + bias[None, :, None, None]
    if residual is not None:
        y = y + residual
    if relu:
        y = jnp.maximum(y, 0.0)
    return y


def reference_forward(params, x):
    p = params
    h = _conv_bn_ref(x, p["conv1_w"], p["bn1"], 1, 1, True)
    r = h
    h = _conv_bn_ref(h, p["l1_conv1_w"], p["l1_bn1"], 1, 1, True)
    h = _conv_bn_ref(h, p["l1_conv2_w"], p["l1_bn2"], 1, 1, True, residual=r)
    r = _conv_bn_ref(h, p["l2_down_w"], p["l2_down_bn"], 2, 0, False)
    h = _conv_bn_ref(h, p["l2_conv1_w"], p["l2_bn1"], 2, 1, True)
    h = _conv_bn_ref(h, p["l2_conv2_w"], p["l2_bn2"], 1, 1, True, residual=r)
    feat = jnp.mean(h, axis=(2, 3)).reshape(1, -1)
    return jnp.matmul(feat, p["fc_w"].T,
                      precision=lax.Precision.HIGHEST) + p["fc_b"][None, :]


if __name__ == "__main__":
    key = jax.random.PRNGKey(0)
    pkey, xkey = jax.random.split(key)
    params = init_params(pkey)
    # batch = 1 because forward() hard-codes x.view((1, -1)); NCHW input.
    x = jax.random.normal(xkey, (1, 4, 16, 16), jnp.float32)

    logits = jax.jit(resnet_cam_forward)(params, x)
    jax.block_until_ready(logits)
    assert logits.shape == (1, 10) and logits.dtype == jnp.float32

    ref = jax.jit(reference_forward)(params, x)
    jax.block_until_ready(ref)
    assert jnp.allclose(logits, ref, atol=1e-3, rtol=1e-3), (logits, ref)
    print("KERNEL_OK")
</pallas_src>

<mosaic_0001>
module attributes {stable_mosaic.version = 11 : i64} {
  func.func @_fused_resnet_kernel(%arg0: memref<8x256xf32, #tpu.memory_space<vmem>>, %arg1: memref<9x256xf32, #tpu.memory_space<vmem>>, %arg2: memref<256x64xf32, #tpu.memory_space<vmem>>, %arg3: memref<9x64x64xf32, #tpu.memory_space<vmem>>, %arg4: memref<9x8x8xf32, #tpu.memory_space<vmem>>, %arg5: memref<8x1xf32, #tpu.memory_space<vmem>>, %arg6: memref<9x8x8xf32, #tpu.memory_space<vmem>>, %arg7: memref<8x1xf32, #tpu.memory_space<vmem>>, %arg8: memref<9x8x8xf32, #tpu.memory_space<vmem>>, %arg9: memref<8x1xf32, #tpu.memory_space<vmem>>, %arg10: memref<9x16x8xf32, #tpu.memory_space<vmem>>, %arg11: memref<16x1xf32, #tpu.memory_space<vmem>>, %arg12: memref<9x16x16xf32, #tpu.memory_space<vmem>>, %arg13: memref<16x1xf32, #tpu.memory_space<vmem>>, %arg14: memref<16x8xf32, #tpu.memory_space<vmem>>, %arg15: memref<16x1xf32, #tpu.memory_space<vmem>>, %arg16: memref<10x16xf32, #tpu.memory_space<vmem>>, %arg17: memref<10x1xf32, #tpu.memory_space<vmem>>, %arg18: memref<10x1xf32, #tpu.memory_space<vmem>>) attributes {dimension_semantics = [], scalar_prefetch = 0 : i64, scratch_operands = 0 : i64, tpu.core_type = #tpu.core_type<tc>} {
    %c0 = arith.constant 0 : index
    %c0_0 = arith.constant 0 : index
    %0 = vector.load %arg1[%c0, %c0_0] : memref<9x256xf32, #tpu.memory_space<vmem>>, vector<9x256xf32>
    %c0_1 = arith.constant 0 : index
    %c0_2 = arith.constant 0 : index
    %1 = vector.load %arg0[%c0_1, %c0_2] : memref<8x256xf32, #tpu.memory_space<vmem>>, vector<8x256xf32>
    %cst = arith.constant 0.000000e+00 : f32
    %2 = vector.broadcast %cst : f32 to vector<8x256xf32>
    %c17_i32 = arith.constant 17 : i32
    %3 = tpu.dynamic_rotate %1 by %c17_i32 dim 1 : vector<8x256xf32>, i32 -> vector<8x256xf32>
    %4 = vector.extract_strided_slice %0 {offsets = [0, 0], sizes = [1, 256], strides = [1, 1]} : vector<9x256xf32> to vector<1x256xf32>
    %5 = vector.broadcast %4 : vector<1x256xf32> to vector<8x256xf32>
    %6 = arith.mulf %3, %5 : vector<8x256xf32>
    %c0_3 = arith.constant 0 : index
    %c0_4 = arith.constant 0 : index
    %c0_5 = arith.constant 0 : index
    %7 = vector.load %arg4[%c0_3, %c0_4, %c0_5] : memref<9x8x8xf32, #tpu.memory_space<vmem>>, vector<1x8x8xf32>
    %8 = vector.shape_cast %7 : vector<1x8x8xf32> to vector<8x8xf32>
    %cst_6 = arith.constant dense<0.000000e+00> : vector<8x256xf32>
    %9 = tpu.matmul %8, %6, %cst_6 {dimension_numbers = #tpu.dot_dimension_numbers<[1], [0], [0], [1], [0, 0, 1, 1], [], []>} : vector<8x8xf32>, vector<8x256xf32>, vector<8x256xf32> -> vector<8x256xf32>
    %10 = arith.addf %2, %9 : vector<8x256xf32>
    %c16_i32 = arith.constant 16 : i32
    %11 = tpu.dynamic_rotate %1 by %c16_i32 dim 1 : vector<8x256xf32>, i32 -> vector<8x256xf32>
    %12 = vector.extract_strided_slice %0 {offsets = [1, 0], sizes = [1, 256], strides = [1, 1]} : vector<9x256xf32> to vector<1x256xf32>
    %13 = vector.broadcast %12 : vector<1x256xf32> to vector<8x256xf32>
    %14 = arith.mulf %11, %13 : vector<8x256xf32>
    %c1 = arith.constant 1 : index
    %c0_7 = arith.constant 0 : index
    %c0_8 = arith.constant 0 : index
    %15 = vector.load %arg4[%c1, %c0_7, %c0_8] : memref<9x8x8xf32, #tpu.memory_space<vmem>>, vector<1x8x8xf32>
    %16 = vector.shape_cast %15 : vector<1x8x8xf32> to vector<8x8xf32>
    %cst_9 = arith.constant dense<0.000000e+00> : vector<8x256xf32>
    %17 = tpu.matmul %16, %14, %cst_9 {dimension_numbers = #tpu.dot_dimension_numbers<[1], [0], [0], [1], [0, 0, 1, 1], [], []>} : vector<8x8xf32>, vector<8x256xf32>, vector<8x256xf32> -> vector<8x256xf32>
    %18 = arith.addf %10, %17 : vector<8x256xf32>
    %c15_i32 = arith.constant 15 : i32
    %19 = tpu.dynamic_rotate %1 by %c15_i32 dim 1 : vector<8x256xf32>, i32 -> vector<8x256xf32>
    %20 = vector.extract_strided_slice %0 {offsets = [2, 0], sizes = [1, 256], strides = [1, 1]} : vector<9x256xf32> to vector<1x256xf32>
    %21 = vector.broadcast %20 : vector<1x256xf32> to vector<8x256xf32>
    %22 = arith.mulf %19, %21 : vector<8x256xf32>
    %c2 = arith.constant 2 : index
    %c0_10 = arith.constant 0 : index
    %c0_11 = arith.constant 0 : index
    %23 = vector.load %arg4[%c2, %c0_10, %c0_11] : memref<9x8x8xf32, #tpu.memory_space<vmem>>, vector<1x8x8xf32>
    %24 = vector.shape_cast %23 : vector<1x8x8xf32> to vector<8x8xf32>
    %cst_12 = arith.constant dense<0.000000e+00> : vector<8x256xf32>
    %25 = tpu.matmul %24, %22, %cst_12 {dimension_numbers = #tpu.dot_dimension_numbers<[1], [0], [0], [1], [0, 0, 1, 1], [], []>} : vector<8x8xf32>, vector<8x256xf32>, vector<8x256xf32> -> vector<8x256xf32>
    %26 = arith.addf %18, %25 : vector<8x256xf32>
    %c1_i32 = arith.constant 1 : i32
    %27 = tpu.dynamic_rotate %1 by %c1_i32 dim 1 : vector<8x256xf32>, i32 -> vector<8x256xf32>
    %28 = vector.extract_strided_slice %0 {offsets = [3, 0], sizes = [1, 256], strides = [1, 1]} : vector<9x256xf32> to vector<1x256xf32>
    %29 = vector.broadcast %28 : vector<1x256xf32> to vector<8x256xf32>
    %30 = arith.mulf %27, %29 : vector<8x256xf32>
    %c3 = arith.constant 3 : index
    %c0_13 = arith.constant 0 : index
    %c0_14 = arith.constant 0 : index
    %31 = vector.load %arg4[%c3, %c0_13, %c0_14] : memref<9x8x8xf32, #tpu.memory_space<vmem>>, vector<1x8x8xf32>
    %32 = vector.shape_cast %31 : vector<1x8x8xf32> to vector<8x8xf32>
    %cst_15 = arith.constant dense<0.000000e+00> : vector<8x256xf32>
    %33 = tpu.matmul %32, %30, %cst_15 {dimension_numbers = #tpu.dot_dimension_numbers<[1], [0], [0], [1], [0, 0, 1, 1], [], []>} : vector<8x8xf32>, vector<8x256xf32>, vector<8x256xf32> -> vector<8x256xf32>
    %34 = arith.addf %26, %33 : vector<8x256xf32>
    %c4 = arith.constant 4 : index
    %c0_16 = arith.constant 0 : index
    %c0_17 = arith.constant 0 : index
    %35 = vector.load %arg4[%c4, %c0_16, %c0_17] : memref<9x8x8xf32, #tpu.memory_space<vmem>>, vector<1x8x8xf32>
    %36 = vector.shape_cast %35 : vector<1x8x8xf32> to vector<8x8xf32>
    %cst_18 = arith.constant dense<0.000000e+00> : vector<8x256xf32>
    %37 = tpu.matmul %36, %1, %cst_18 {dimension_numbers = #tpu.dot_dimension_numbers<[1], [0], [0], [1], [0, 0, 1, 1], [], []>} : vector<8x8xf32>, vector<8x256xf32>, vector<8x256xf32> -> vector<8x256xf32>
    %38 = arith.addf %34, %37 : vector<8x256xf32>
    %c255_i32 = arith.constant 255 : i32
    %39 = tpu.dynamic_rotate %1 by %c255_i32 dim 1 : vector<8x256xf32>, i32 -> vector<8x256xf32>
    %40 = vector.extract_strided_slice %0 {offsets = [5, 0], sizes = [1, 256], strides = [1, 1]} : vector<9x256xf32> to vector<1x256xf32>
    %41 = vector.broadcast %40 : vector<1x256xf32> to vector<8x256xf32>
    %42 = arith.mulf %39, %41 : vector<8x256xf32>
    %c5 = arith.constant 5 : index
    %c0_19 = arith.constant 0 : index
    %c0_20 = arith.constant 0 : index
    %43 = vector.load %arg4[%c5, %c0_19, %c0_20] : memref<9x8x8xf32, #tpu.memory_space<vmem>>, vector<1x8x8xf32>
    %44 = vector.shape_cast %43 : vector<1x8x8xf32> to vector<8x8xf32>
    %cst_21 = arith.constant dense<0.000000e+00> : vector<8x256xf32>
    %45 = tpu.matmul %44, %42, %cst_21 {dimension_numbers = #tpu.dot_dimension_numbers<[1], [0], [0], [1], [0, 0, 1, 1], [], []>} : vector<8x8xf32>, vector<8x256xf32>, vector<8x256xf32> -> vector<8x256xf32>
    %46 = arith.addf %38, %45 : vector<8x256xf32>
    %c241_i32 = arith.constant 241 : i32
    %47 = tpu.dynamic_rotate %1 by %c241_i32 dim 1 : vector<8x256xf32>, i32 -> vector<8x256xf32>
    %48 = vector.extract_strided_slice %0 {offsets = [6, 0], sizes = [1, 256], strides = [1, 1]} : vector<9x256xf32> to vector<1x256xf32>
    %49 = vector.broadcast %48 : vector<1x256xf32> to vector<8x256xf32>
    %50 = arith.mulf %47, %49 : vector<8x256xf32>
    %c6 = arith.constant 6 : index
    %c0_22 = arith.constant 0 : index
    %c0_23 = arith.constant 0 : index
    %51 = vector.load %arg4[%c6, %c0_22, %c0_23] : memref<9x8x8xf32, #tpu.memory_space<vmem>>, vector<1x8x8xf32>
    %52 = vector.shape_cast %51 : vector<1x8x8xf32> to vector<8x8xf32>
    %cst_24 = arith.constant dense<0.000000e+00> : vector<8x256xf32>
    %53 = tpu.matmul %52, %50, %cst_24 {dimension_numbers = #tpu.dot_dimension_numbers<[1], [0], [0], [1], [0, 0, 1, 1], [], []>} : vector<8x8xf32>, vector<8x256xf32>, vector<8x256xf32> -> vector<8x256xf32>
    %54 = arith.addf %46, %53 : vector<8x256xf32>
    %c240_i32 = arith.constant 240 : i32
    %55 = tpu.dynamic_rotate %1 by %c240_i32 dim 1 : vector<8x256xf32>, i32 -> vector<8x256xf32>
    %56 = vector.extract_strided_slice %0 {offsets = [7, 0], sizes = [1, 256], strides = [1, 1]} : vector<9x256xf32> to vector<1x256xf32>
    %57 = vector.broadcast %56 : vector<1x256xf32> to vector<8x256xf32>
    %58 = arith.mulf %55, %57 : vector<8x256xf32>
    %c7 = arith.constant 7 : index
    %c0_25 = arith.constant 0 : index
    %c0_26 = arith.constant 0 : index
    %59 = vector.load %arg4[%c7, %c0_25, %c0_26] : memref<9x8x8xf32, #tpu.memory_space<vmem>>, vector<1x8x8xf32>
    %60 = vector.shape_cast %59 : vector<1x8x8xf32> to vector<8x8xf32>
    %cst_27 = arith.constant dense<0.000000e+00> : vector<8x256xf32>
    %61 = tpu.matmul %60, %58, %cst_27 {dimension_numbers = #tpu.dot_dimension_numbers<[1], [0], [0], [1], [0, 0, 1, 1], [], []>} : vector<8x8xf32>, vector<8x256xf32>, vector<8x256xf32> -> vector<8x256xf32>
    %62 = arith.addf %54, %61 : vector<8x256xf32>
    %c239_i32 = arith.constant 239 : i32
    %63 = tpu.dynamic_rotate %1 by %c239_i32 dim 1 : vector<8x256xf32>, i32 -> vector<8x256xf32>
    %64 = vector.extract_strided_slice %0 {offsets = [8, 0], sizes = [1, 256], strides = [1, 1]} : vector<9x256xf32> to vector<1x256xf32>
    %65 = vector.broadcast %64 : vector<1x256xf32> to vector<8x256xf32>
    %66 = arith.mulf %63, %65 : vector<8x256xf32>
    %c8 = arith.constant 8 : index
    %c0_28 = arith.constant 0 : index
    %c0_29 = arith.constant 0 : index
    %67 = vector.load %arg4[%c8, %c0_28, %c0_29] : memref<9x8x8xf32, #tpu.memory_space<vmem>>, vector<1x8x8xf32>
    %68 = vector.shape_cast %67 : vector<1x8x8xf32> to vector<8x8xf32>
    %cst_30 = arith.constant dense<0.000000e+00> : vector<8x256xf32>
    %69 = tpu.matmul %68, %66, %cst_30 {dimension_numbers = #tpu.dot_dimension_numbers<[1], [0], [0], [1], [0, 0, 1, 1], [], []>} : vector<8x8xf32>, vector<8x256xf32>, vector<8x256xf32> -> vector<8x256xf32>
    %70 = arith.addf %62, %69 : vector<8x256xf32>
    %c0_31 = arith.constant 0 : index
    %c0_32 = arith.constant 0 : index
    %71 = vector.load %arg5[%c0_31, %c0_32] : memref<8x1xf32, #tpu.memory_space<vmem>>, vector<8x1xf32>
    %72 = vector.broadcast %71 : vector<8x1xf32> to vector<8x256xf32>
    %73 = arith.addf %70, %72 : vector<8x256xf32>
    %cst_33 = arith.constant 0.000000e+00 : f32
    %74 = vector.broadcast %cst_33 : f32 to vector<8x256xf32>
    %75 = arith.maximumf %73, %74 : vector<8x256xf32>
    %cst_34 = arith.constant 0.000000e+00 : f32
    %76 = vector.broadcast %cst_34 : f32 to vector<8x256xf32>
    %c17_i32_35 = arith.constant 17 : i32
    %77 = tpu.dynamic_rotate %75 by %c17_i32_35 dim 1 : vector<8x256xf32>, i32 -> vector<8x256xf32>
    %78 = vector.extract_strided_slice %0 {offsets = [0, 0], sizes = [1, 256], strides = [1, 1]} : vector<9x256xf32> to vector<1x256xf32>
    %79 = vector.broadcast %78 : vector<1x256xf32> to vector<8x256xf32>
    %80 = arith.mulf %77, %79 : vector<8x256xf32>
    %c0_36 = arith.constant 0 : index
    %c0_37 = arith.constant 0 : index
    %c0_38 = arith.constant 0 : index
    %81 = vector.load %arg6[%c0_36, %c0_37, %c0_38] : memref<9x8x8xf32, #tpu.memory_space<vmem>>, vector<1x8x8xf32>
    %82 = vector.shape_cast %81 : vector<1x8x8xf32> to vector<8x8xf32>
    %cst_39 = arith.constant dense<0.000000e+00> : vector<8x256xf32>
    %83 = tpu.matmul %82, %80, %cst_39 {dimension_numbers = #tpu.dot_dimension_numbers<[1], [0], [0], [1], [0, 0, 1, 1], [], []>} : vector<8x8xf32>, vector<8x256xf32>, vector<8x256xf32> -> vector<8x256xf32>
    %84 = arith.addf %76, %83 : vector<8x256xf32>
    %c16_i32_40 = arith.constant 16 : i32
    %85 = tpu.dynamic_rotate %75 by %c16_i32_40 dim 1 : vector<8x256xf32>, i32 -> vector<8x256xf32>
    %86 = vector.extract_strided_slice %0 {offsets = [1, 0], sizes = [1, 256], strides = [1, 1]} : vector<9x256xf32> to vector<1x256xf32>
    %87 = vector.broadcast %86 : vector<1x256xf32> to vector<8x256xf32>
    %88 = arith.mulf %85, %87 : vector<8x256xf32>
    %c1_41 = arith.constant 1 : index
    %c0_42 = arith.constant 0 : index
    %c0_43 = arith.constant 0 : index
    %89 = vector.load %arg6[%c1_41, %c0_42, %c0_43] : memref<9x8x8xf32, #tpu.memory_space<vmem>>, vector<1x8x8xf32>
    %90 = vector.shape_cast %89 : vector<1x8x8xf32> to vector<8x8xf32>
    %cst_44 = arith.constant dense<0.000000e+00> : vector<8x256xf32>
    %91 = tpu.matmul %90, %88, %cst_44 {dimension_numbers = #tpu.dot_dimension_numbers<[1], [0], [0], [1], [0, 0, 1, 1], [], []>} : vector<8x8xf32>, vector<8x256xf32>, vector<8x256xf32> -> vector<8x256xf32>
    %92 = arith.addf %84, %91 : vector<8x256xf32>
    %c15_i32_45 = arith.constant 15 : i32
    %93 = tpu.dynamic_rotate %75 by %c15_i32_45 dim 1 : vector<8x256xf32>, i32 -> vector<8x256xf32>
    %94 = vector.extract_strided_slice %0 {offsets = [2, 0], sizes = [1, 256], strides = [1, 1]} : vector<9x256xf32> to vector<1x256xf32>
    %95 = vector.broadcast %94 : vector<1x256xf32> to vector<8x256xf32>
    %96 = arith.mulf %93, %95 : vector<8x256xf32>
    %c2_46 = arith.constant 2 : index
    %c0_47 = arith.constant 0 : index
    %c0_48 = arith.constant 0 : index
    %97 = vector.load %arg6[%c2_46, %c0_47, %c0_48] : memref<9x8x8xf32, #tpu.memory_space<vmem>>, vector<1x8x8xf32>
    %98 = vector.shape_cast %97 : vector<1x8x8xf32> to vector<8x8xf32>
    %cst_49 = arith.constant dense<0.000000e+00> : vector<8x256xf32>
    %99 = tpu.matmul %98, %96, %cst_49 {dimension_numbers = #tpu.dot_dimension_numbers<[1], [0], [0], [1], [0, 0, 1, 1], [], []>} : vector<8x8xf32>, vector<8x256xf32>, vector<8x256xf32> -> vector<8x256xf32>
    %100 = arith.addf %92, %99 : vector<8x256xf32>
    %c1_i32_50 = arith.constant 1 : i32
    %101 = tpu.dynamic_rotate %75 by %c1_i32_50 dim 1 : vector<8x256xf32>, i32 -> vector<8x256xf32>
    %102 = vector.extract_strided_slice %0 {offsets = [3, 0], sizes = [1, 256], strides = [1, 1]} : vector<9x256xf32> to vector<1x256xf32>
    %103 = vector.broadcast %102 : vector<1x256xf32> to vector<8x256xf32>
    %104 = arith.mulf %101, %103 : vector<8x256xf32>
    %c3_51 = arith.constant 3 : index
    %c0_52 = arith.constant 0 : index
    %c0_53 = arith.constant 0 : index
    %105 = vector.load %arg6[%c3_51, %c0_52, %c0_53] : memref<9x8x8xf32, #tpu.memory_space<vmem>>, vector<1x8x8xf32>
    %106 = vector.shape_cast %105 : vector<1x8x8xf32> to vector<8x8xf32>
    %cst_54 = arith.constant dense<0.000000e+00> : vector<8x256xf32>
    %107 = tpu.matmul %106, %104, %cst_54 {dimension_numbers = #tpu.dot_dimension_numbers<[1], [0], [0], [1], [0, 0, 1, 1], [], []>} : vector<8x8xf32>, vector<8x256xf32>, vector<8x256xf32> -> vector<8x256xf32>
    %108 = arith.addf %100, %107 : vector<8x256xf32>
    %c4_55 = arith.constant 4 : index
    %c0_56 = arith.constant 0 : index
    %c0_57 = arith.constant 0 : index
    %109 = vector.load %arg6[%c4_55, %c0_56, %c0_57] : memref<9x8x8xf32, #tpu.memory_space<vmem>>, vector<1x8x8xf32>
    %110 = vector.shape_cast %109 : vector<1x8x8xf32> to vector<8x8xf32>
    %cst_58 = arith.constant dense<0.000000e+00> : vector<8x256xf32>
    %111 = tpu.matmul %110, %75, %cst_58 {dimension_numbers = #tpu.dot_dimension_numbers<[1], [0], [0], [1], [0, 0, 1, 1], [], []>} : vector<8x8xf32>, vector<8x256xf32>, vector<8x256xf32> -> vector<8x256xf32>
    %112 = arith.addf %108, %111 : vector<8x256xf32>
    %c255_i32_59 = arith.constant 255 : i32
    %113 = tpu.dynamic_rotate %75 by %c255_i32_59 dim 1 : vector<8x256xf32>, i32 -> vector<8x256xf32>
    %114 = vector.extract_strided_slice %0 {offsets = [5, 0], sizes = [1, 256], strides = [1, 1]} : vector<9x256xf32> to vector<1x256xf32>
    %115 = vector.broadcast %114 : vector<1x256xf32> to vector<8x256xf32>
    %116 = arith.mulf %113, %115 : vector<8x256xf32>
    %c5_60 = arith.constant 5 : index
    %c0_61 = arith.constant 0 : index
    %c0_62 = arith.constant 0 : index
    %117 = vector.load %arg6[%c5_60, %c0_61, %c0_62] : memref<9x8x8xf32, #tpu.memory_space<vmem>>, vector<1x8x8xf32>
    %118 = vector.shape_cast %117 : vector<1x8x8xf32> to vector<8x8xf32>
    %cst_63 = arith.constant dense<0.000000e+00> : vector<8x256xf32>
    %119 = tpu.matmul %118, %116, %cst_63 {dimension_numbers = #tpu.dot_dimension_numbers<[1], [0], [0], [1], [0, 0, 1, 1], [], []>} : vector<8x8xf32>, vector<8x256xf32>, vector<8x256xf32> -> vector<8x256xf32>
    %120 = arith.addf %112, %119 : vector<8x256xf32>
    %c241_i32_64 = arith.constant 241 : i32
    %121 = tpu.dynamic_rotate %75 by %c241_i32_64 dim 1 : vector<8x256xf32>, i32 -> vector<8x256xf32>
    %122 = vector.extract_strided_slice %0 {offsets = [6, 0], sizes = [1, 256], strides = [1, 1]} : vector<9x256xf32> to vector<1x256xf32>
    %123 = vector.broadcast %122 : vector<1x256xf32> to vector<8x256xf32>
    %124 = arith.mulf %121, %123 : vector<8x256xf32>
    %c6_65 = arith.constant 6 : index
    %c0_66 = arith.constant 0 : index
    %c0_67 = arith.constant 0 : index
    %125 = vector.load %arg6[%c6_65, %c0_66, %c0_67] : memref<9x8x8xf32, #tpu.memory_space<vmem>>, vector<1x8x8xf32>
    %126 = vector.shape_cast %125 : vector<1x8x8xf32> to vector<8x8xf32>
    %cst_68 = arith.constant dense<0.000000e+00> : vector<8x256xf32>
    %127 = tpu.matmul %126, %124, %cst_68 {dimension_numbers = #tpu.dot_dimension_numbers<[1], [0], [0], [1], [0, 0, 1, 1], [], []>} : vector<8x8xf32>, vector<8x256xf32>, vector<8x256xf32> -> vector<8x256xf32>
    %128 = arith.addf %120, %127 : vector<8x256xf32>
    %c240_i32_69 = arith.constant 240 : i32
    %129 = tpu.dynamic_rotate %75 by %c240_i32_69 dim 1 : vector<8x256xf32>, i32 -> vector<8x256xf32>
    %130 = vector.extract_strided_slice %0 {offsets = [7, 0], sizes = [1, 256], strides = [1, 1]} : vector<9x256xf32> to vector<1x256xf32>
    %131 = vector.broadcast %130 : vector<1x256xf32> to vector<8x256xf32>
    %132 = arith.mulf %129, %131 : vector<8x256xf32>
    %c7_70 = arith.constant 7 : index
    %c0_71 = arith.constant 0 : index
    %c0_72 = arith.constant 0 : index
    %133 = vector.load %arg6[%c7_70, %c0_71, %c0_72] : memref<9x8x8xf32, #tpu.memory_space<vmem>>, vector<1x8x8xf32>
    %134 = vector.shape_cast %133 : vector<1x8x8xf32> to vector<8x8xf32>
    %cst_73 = arith.constant dense<0.000000e+00> : vector<8x256xf32>
    %135 = tpu.matmul %134, %132, %cst_73 {dimension_numbers = #tpu.dot_dimension_numbers<[1], [0], [0], [1], [0, 0, 1, 1], [], []>} : vector<8x8xf32>, vector<8x256xf32>, vector<8x256xf32> -> vector<8x256xf32>
    %136 = arith.addf %128, %135 : vector<8x256xf32>
    %c239_i32_74 = arith.constant 239 : i32
    %137 = tpu.dynamic_rotate %75 by %c239_i32_74 dim 1 : vector<8x256xf32>, i32 -> vector<8x256xf32>
    %138 = vector.extract_strided_slice %0 {offsets = [8, 0], sizes = [1, 256], strides = [1, 1]} : vector<9x256xf32> to vector<1x256xf32>
    %139 = vector.broadcast %138 : vector<1x256xf32> to vector<8x256xf32>
    %140 = arith.mulf %137, %139 : vector<8x256xf32>
    %c8_75 = arith.constant 8 : index
    %c0_76 = arith.constant 0 : index
    %c0_77 = arith.constant 0 : index
    %141 = vector.load %arg6[%c8_75, %c0_76, %c0_77] : memref<9x8x8xf32, #tpu.memory_space<vmem>>, vector<1x8x8xf32>
    %142 = vector.shape_cast %141 : vector<1x8x8xf32> to vector<8x8xf32>
    %cst_78 = arith.constant dense<0.000000e+00> : vector<8x256xf32>
    %143 = tpu.matmul %142, %140, %cst_78 {dimension_numbers = #tpu.dot_dimension_numbers<[1], [0], [0], [1], [0, 0, 1, 1], [], []>} : vector<8x8xf32>, vector<8x256xf32>, vector<8x256xf32> -> vector<8x256xf32>
    %144 = arith.addf %136, %143 : vector<8x256xf32>
    %c0_79 = arith.constant 0 : index
    %c0_80 = arith.constant 0 : index
    %145 = vector.load %arg7[%c0_79, %c0_80] : memref<8x1xf32, #tpu.memory_space<vmem>>, vector<8x1xf32>
    %146 = vector.broadcast %145 : vector<8x1xf32> to vector<8x256xf32>
    %147 = arith.addf %144, %146 : vector<8x256xf32>
    %cst_81 = arith.constant 0.000000e+00 : f32
    %148 = vector.broadcast %cst_81 : f32 to vector<8x256xf32>
    %149 = arith.maximumf %147, %148 : vector<8x256xf32>
    %cst_82 = arith.constant 0.000000e+00 : f32
    %150 = vector.broadcast %cst_82 : f32 to vector<8x256xf32>
    %c17_i32_83 = arith.constant 17 : i32
    %151 = tpu.dynamic_rotate %149 by %c17_i32_83 dim 1 : vector<8x256xf32>, i32 -> vector<8x256xf32>
    %152 = vector.extract_strided_slice %0 {offsets = [0, 0], sizes = [1, 256], strides = [1, 1]} : vector<9x256xf32> to vector<1x256xf32>
    %153 = vector.broadcast %152 : vector<1x256xf32> to vector<8x256xf32>
    %154 = arith.mulf %151, %153 : vector<8x256xf32>
    %c0_84 = arith.constant 0 : index
    %c0_85 = arith.constant 0 : index
    %c0_86 = arith.constant 0 : index
    %155 = vector.load %arg8[%c0_84, %c0_85, %c0_86] : memref<9x8x8xf32, #tpu.memory_space<vmem>>, vector<1x8x8xf32>
    %156 = vector.shape_cast %155 : vector<1x8x8xf32> to vector<8x8xf32>
    %cst_87 = arith.constant dense<0.000000e+00> : vector<8x256xf32>
    %157 = tpu.matmul %156, %154, %cst_87 {dimension_numbers = #tpu.dot_dimension_numbers<[1], [0], [0], [1], [0, 0, 1, 1], [], []>} : vector<8x8xf32>, vector<8x256xf32>, vector<8x256xf32> -> vector<8x256xf32>
    %158 = arith.addf %150, %157 : vector<8x256xf32>
    %c16_i32_88 = arith.constant 16 : i32
    %159 = tpu.dynamic_rotate %149 by %c16_i32_88 dim 1 : vector<8x256xf32>, i32 -> vector<8x256xf32>
    %160 = vector.extract_strided_slice %0 {offsets = [1, 0], sizes = [1, 256], strides = [1, 1]} : vector<9x256xf32> to vector<1x256xf32>
    %161 = vector.broadcast %160 : vector<1x256xf32> to vector<8x256xf32>
    %162 = arith.mulf %159, %161 : vector<8x256xf32>
    %c1_89 = arith.constant 1 : index
    %c0_90 = arith.constant 0 : index
    %c0_91 = arith.constant 0 : index
    %163 = vector.load %arg8[%c1_89, %c0_90, %c0_91] : memref<9x8x8xf32, #tpu.memory_space<vmem>>, vector<1x8x8xf32>
    %164 = vector.shape_cast %163 : vector<1x8x8xf32> to vector<8x8xf32>
    %cst_92 = arith.constant dense<0.000000e+00> : vector<8x256xf32>
    %165 = tpu.matmul %164, %162, %cst_92 {dimension_numbers = #tpu.dot_dimension_numbers<[1], [0], [0], [1], [0, 0, 1, 1], [], []>} : vector<8x8xf32>, vector<8x256xf32>, vector<8x256xf32> -> vector<8x256xf32>
    %166 = arith.addf %158, %165 : vector<8x256xf32>
    %c15_i32_93 = arith.constant 15 : i32
    %167 = tpu.dynamic_rotate %149 by %c15_i32_93 dim 1 : vector<8x256xf32>, i32 -> vector<8x256xf32>
    %168 = vector.extract_strided_slice %0 {offsets = [2, 0], sizes = [1, 256], strides = [1, 1]} : vector<9x256xf32> to vector<1x256xf32>
    %169 = vector.broadcast %168 : vector<1x256xf32> to vector<8x256xf32>
    %170 = arith.mulf %167, %169 : vector<8x256xf32>
    %c2_94 = arith.constant 2 : index
    %c0_95 = arith.constant 0 : index
    %c0_96 = arith.constant 0 : index
    %171 = vector.load %arg8[%c2_94, %c0_95, %c0_96] : memref<9x8x8xf32, #tpu.memory_space<vmem>>, vector<1x8x8xf32>
    %172 = vector.shape_cast %171 : vector<1x8x8xf32> to vector<8x8xf32>
    %cst_97 = arith.constant dense<0.000000e+00> : vector<8x256xf32>
    %173 = tpu.matmul %172, %170, %cst_97 {dimension_numbers = #tpu.dot_dimension_numbers<[1], [0], [0], [1], [0, 0, 1, 1], [], []>} : vector<8x8xf32>, vector<8x256xf32>, vector<8x256xf32> -> vector<8x256xf32>
    %174 = arith.addf %166, %173 : vector<8x256xf32>
    %c1_i32_98 = arith.constant 1 : i32
    %175 = tpu.dynamic_rotate %149 by %c1_i32_98 dim 1 : vector<8x256xf32>, i32 -> vector<8x256xf32>
    %176 = vector.extract_strided_slice %0 {offsets = [3, 0], sizes = [1, 256], strides = [1, 1]} : vector<9x256xf32> to vector<1x256xf32>
    %177 = vector.broadcast %176 : vector<1x256xf32> to vector<8x256xf32>
    %178 = arith.mulf %175, %177 : vector<8x256xf32>
    %c3_99 = arith.constant 3 : index
    %c0_100 = arith.constant 0 : index
    %c0_101 = arith.constant 0 : index
    %179 = vector.load %arg8[%c3_99, %c0_100, %c0_101] : memref<9x8x8xf32, #tpu.memory_space<vmem>>, vector<1x8x8xf32>
    %180 = vector.shape_cast %179 : vector<1x8x8xf32> to vector<8x8xf32>
    %cst_102 = arith.constant dense<0.000000e+00> : vector<8x256xf32>
    %181 = tpu.matmul %180, %178, %cst_102 {dimension_numbers = #tpu.dot_dimension_numbers<[1], [0], [0], [1], [0, 0, 1, 1], [], []>} : vector<8x8xf32>, vector<8x256xf32>, vector<8x256xf32> -> vector<8x256xf32>
    %182 = arith.addf %174, %181 : vector<8x256xf32>
    %c4_103 = arith.constant 4 : index
    %c0_104 = arith.constant 0 : index
    %c0_105 = arith.constant 0 : index
    %183 = vector.load %arg8[%c4_103, %c0_104, %c0_105] : memref<9x8x8xf32, #tpu.memory_space<vmem>>, vector<1x8x8xf32>
    %184 = vector.shape_cast %183 : vector<1x8x8xf32> to vector<8x8xf32>
    %cst_106 = arith.constant dense<0.000000e+00> : vector<8x256xf32>
    %185 = tpu.matmul %184, %149, %cst_106 {dimension_numbers = #tpu.dot_dimension_numbers<[1], [0], [0], [1], [0, 0, 1, 1], [], []>} : vector<8x8xf32>, vector<8x256xf32>, vector<8x256xf32> -> vector<8x256xf32>
    %186 = arith.addf %182, %185 : vector<8x256xf32>
    %c255_i32_107 = arith.constant 255 : i32
    %187 = tpu.dynamic_rotate %149 by %c255_i32_107 dim 1 : vector<8x256xf32>, i32 -> vector<8x256xf32>
    %188 = vector.extract_strided_slice %0 {offsets = [5, 0], sizes = [1, 256], strides = [1, 1]} : vector<9x256xf32> to vector<1x256xf32>
    %189 = vector.broadcast %188 : vector<1x256xf32> to vector<8x256xf32>
    %190 = arith.mulf %187, %189 : vector<8x256xf32>
    %c5_108 = arith.constant 5 : index
    %c0_109 = arith.constant 0 : index
    %c0_110 = arith.constant 0 : index
    %191 = vector.load %arg8[%c5_108, %c0_109, %c0_110] : memref<9x8x8xf32, #tpu.memory_space<vmem>>, vector<1x8x8xf32>
    %192 = vector.shape_cast %191 : vector<1x8x8xf32> to vector<8x8xf32>
    %cst_111 = arith.constant dense<0.000000e+00> : vector<8x256xf32>
    %193 = tpu.matmul %192, %190, %cst_111 {dimension_numbers = #tpu.dot_dimension_numbers<[1], [0], [0], [1], [0, 0, 1, 1], [], []>} : vector<8x8xf32>, vector<8x256xf32>, vector<8x256xf32> -> vector<8x256xf32>
    %194 = arith.addf %186, %193 : vector<8x256xf32>
    %c241_i32_112 = arith.constant 241 : i32
    %195 = tpu.dynamic_rotate %149 by %c241_i32_112 dim 1 : vector<8x256xf32>, i32 -> vector<8x256xf32>
    %196 = vector.extract_strided_slice %0 {offsets = [6, 0], sizes = [1, 256], strides = [1, 1]} : vector<9x256xf32> to vector<1x256xf32>
    %197 = vector.broadcast %196 : vector<1x256xf32> to vector<8x256xf32>
    %198 = arith.mulf %195, %197 : vector<8x256xf32>
    %c6_113 = arith.constant 6 : index
    %c0_114 = arith.constant 0 : index
    %c0_115 = arith.constant 0 : index
    %199 = vector.load %arg8[%c6_113, %c0_114, %c0_115] : memref<9x8x8xf32, #tpu.memory_space<vmem>>, vector<1x8x8xf32>
    %200 = vector.shape_cast %199 : vector<1x8x8xf32> to vector<8x8xf32>
    %cst_116 = arith.constant dense<0.000000e+00> : vector<8x256xf32>
    %201 = tpu.matmul %200, %198, %cst_116 {dimension_numbers = #tpu.dot_dimension_numbers<[1], [0], [0], [1], [0, 0, 1, 1], [], []>} : vector<8x8xf32>, vector<8x256xf32>, vector<8x256xf32> -> vector<8x256xf32>
    %202 = arith.addf %194, %201 : vector<8x256xf32>
    %c240_i32_117 = arith.constant 240 : i32
    %203 = tpu.dynamic_rotate %149 by %c240_i32_117 dim 1 : vector<8x256xf32>, i32 -> vector<8x256xf32>
    %204 = vector.extract_strided_slice %0 {offsets = [7, 0], sizes = [1, 256], strides = [1, 1]} : vector<9x256xf32> to vector<1x256xf32>
    %205 = vector.broadcast %204 : vector<1x256xf32> to vector<8x256xf32>
    %206 = arith.mulf %203, %205 : vector<8x256xf32>
    %c7_118 = arith.constant 7 : index
    %c0_119 = arith.constant 0 : index
    %c0_120 = arith.constant 0 : index
    %207 = vector.load %arg8[%c7_118, %c0_119, %c0_120] : memref<9x8x8xf32, #tpu.memory_space<vmem>>, vector<1x8x8xf32>
    %208 = vector.shape_cast %207 : vector<1x8x8xf32> to vector<8x8xf32>
    %cst_121 = arith.constant dense<0.000000e+00> : vector<8x256xf32>
    %209 = tpu.matmul %208, %206, %cst_121 {dimension_numbers = #tpu.dot_dimension_numbers<[1], [0], [0], [1], [0, 0, 1, 1], [], []>} : vector<8x8xf32>, vector<8x256xf32>, vector<8x256xf32> -> vector<8x256xf32>
    %210 = arith.addf %202, %209 : vector<8x256xf32>
    %c239_i32_122 = arith.constant 239 : i32
    %211 = tpu.dynamic_rotate %149 by %c239_i32_122 dim 1 : vector<8x256xf32>, i32 -> vector<8x256xf32>
    %212 = vector.extract_strided_slice %0 {offsets = [8, 0], sizes = [1, 256], strides = [1, 1]} : vector<9x256xf32> to vector<1x256xf32>
    %213 = vector.broadcast %212 : vector<1x256xf32> to vector<8x256xf32>
    %214 = arith.mulf %211, %213 : vector<8x256xf32>
    %c8_123 = arith.constant 8 : index
    %c0_124 = arith.constant 0 : index
    %c0_125 = arith.constant 0 : index
    %215 = vector.load %arg8[%c8_123, %c0_124, %c0_125] : memref<9x8x8xf32, #tpu.memory_space<vmem>>, vector<1x8x8xf32>
    %216 = vector.shape_cast %215 : vector<1x8x8xf32> to vector<8x8xf32>
    %cst_126 = arith.constant dense<0.000000e+00> : vector<8x256xf32>
    %217 = tpu.matmul %216, %214, %cst_126 {dimension_numbers = #tpu.dot_dimension_numbers<[1], [0], [0], [1], [0, 0, 1, 1], [], []>} : vector<8x8xf32>, vector<8x256xf32>, vector<8x256xf32> -> vector<8x256xf32>
    %218 = arith.addf %210, %217 : vector<8x256xf32>
    %c0_127 = arith.constant 0 : index
    %c0_128 = arith.constant 0 : index
    %219 = vector.load %arg9[%c0_127, %c0_128] : memref<8x1xf32, #tpu.memory_space<vmem>>, vector<8x1xf32>
    %220 = vector.broadcast %219 : vector<8x1xf32> to vector<8x256xf32>
    %221 = arith.addf %218, %220 : vector<8x256xf32>
    %222 = arith.addf %221, %75 : vector<8x256xf32>
    %cst_129 = arith.constant 0.000000e+00 : f32
    %223 = vector.broadcast %cst_129 : f32 to vector<8x256xf32>
    %224 = arith.maximumf %222, %223 : vector<8x256xf32>
    %c0_130 = arith.constant 0 : index
    %c0_131 = arith.constant 0 : index
    %225 = vector.load %arg2[%c0_130, %c0_131] : memref<256x64xf32, #tpu.memory_space<vmem>>, vector<256x64xf32>
    %c0_132 = arith.constant 0 : index
    %c0_133 = arith.constant 0 : index
    %226 = vector.load %arg14[%c0_132, %c0_133] : memref<16x8xf32, #tpu.memory_space<vmem>>, vector<16x8xf32>
    %cst_134 = arith.constant dense<0.000000e+00> : vector<16x256xf32>
    %227 = tpu.matmul %226, %224, %cst_134 {dimension_numbers = #tpu.dot_dimension_numbers<[1], [0], [0], [1], [0, 0, 1, 1], [], []>} : vector<16x8xf32>, vector<8x256xf32>, vector<16x256xf32> -> vector<16x256xf32>
    %cst_135 = arith.constant dense<0.000000e+00> : vector<16x64xf32>
    %228 = tpu.matmul %227, %225, %cst_135 {dimension_numbers = #tpu.dot_dimension_numbers<[1], [0], [0], [1], [0, 0, 1, 1], [], []>} : vector<16x256xf32>, vector<256x64xf32>, vector<16x64xf32> -> vector<16x64xf32>
    %c0_136 = arith.constant 0 : index
    %c0_137 = arith.constant 0 : index
    %229 = vector.load %arg15[%c0_136, %c0_137] : memref<16x1xf32, #tpu.memory_space<vmem>>, vector<16x1xf32>
    %230 = vector.broadcast %229 : vector<16x1xf32> to vector<16x64xf32>
    %231 = arith.addf %228, %230 : vector<16x64xf32>
    %cst_138 = arith.constant 0.000000e+00 : f32
    %232 = vector.broadcast %cst_138 : f32 to vector<16x256xf32>
    %c17_i32_139 = arith.constant 17 : i32
    %233 = tpu.dynamic_rotate %224 by %c17_i32_139 dim 1 : vector<8x256xf32>, i32 -> vector<8x256xf32>
    %234 = vector.extract_strided_slice %0 {offsets = [0, 0], sizes = [1, 256], strides = [1, 1]} : vector<9x256xf32> to vector<1x256xf32>
    %235 = vector.broadcast %234 : vector<1x256xf32> to vector<8x256xf32>
    %236 = arith.mulf %233, %235 : vector<8x256xf32>
    %c0_140 = arith.constant 0 : index
    %c0_141 = arith.constant 0 : index
    %c0_142 = arith.constant 0 : index
    %237 = vector.load %arg10[%c0_140, %c0_141, %c0_142] : memref<9x16x8xf32, #tpu.memory_space<vmem>>, vector<1x16x8xf32>
    %238 = vector.shape_cast %237 : vector<1x16x8xf32> to vector<16x8xf32>
    %cst_143 = arith.constant dense<0.000000e+00> : vector<16x256xf32>
    %239 = tpu.matmul %238, %236, %cst_143 {dimension_numbers = #tpu.dot_dimension_numbers<[1], [0], [0], [1], [0, 0, 1, 1], [], []>} : vector<16x8xf32>, vector<8x256xf32>, vector<16x256xf32> -> vector<16x256xf32>
    %240 = arith.addf %232, %239 : vector<16x256xf32>
    %c16_i32_144 = arith.constant 16 : i32
    %241 = tpu.dynamic_rotate %224 by %c16_i32_144 dim 1 : vector<8x256xf32>, i32 -> vector<8x256xf32>
    %242 = vector.extract_strided_slice %0 {offsets = [1, 0], sizes = [1, 256], strides = [1, 1]} : vector<9x256xf32> to vector<1x256xf32>
    %243 = vector.broadcast %242 : vector<1x256xf32> to vector<8x256xf32>
    %244 = arith.mulf %241, %243 : vector<8x256xf32>
    %c1_145 = arith.constant 1 : index
    %c0_146 = arith.constant 0 : index
    %c0_147 = arith.constant 0 : index
    %245 = vector.load %arg10[%c1_145, %c0_146, %c0_147] : memref<9x16x8xf32, #tpu.memory_space<vmem>>, vector<1x16x8xf32>
    %246 = vector.shape_cast %245 : vector<1x16x8xf32> to vector<16x8xf32>
    %cst_148 = arith.constant dense<0.000000e+00> : vector<16x256xf32>
    %247 = tpu.matmul %246, %244, %cst_148 {dimension_numbers = #tpu.dot_dimension_numbers<[1], [0], [0], [1], [0, 0, 1, 1], [], []>} : vector<16x8xf32>, vector<8x256xf32>, vector<16x256xf32> -> vector<16x256xf32>
    %248 = arith.addf %240, %247 : vector<16x256xf32>
    %c15_i32_149 = arith.constant 15 : i32
    %249 = tpu.dynamic_rotate %224 by %c15_i32_149 dim 1 : vector<8x256xf32>, i32 -> vector<8x256xf32>
    %250 = vector.extract_strided_slice %0 {offsets = [2, 0], sizes = [1, 256], strides = [1, 1]} : vector<9x256xf32> to vector<1x256xf32>
    %251 = vector.broadcast %250 : vector<1x256xf32> to vector<8x256xf32>
    %252 = arith.mulf %249, %251 : vector<8x256xf32>
    %c2_150 = arith.constant 2 : index
    %c0_151 = arith.constant 0 : index
    %c0_152 = arith.constant 0 : index
    %253 = vector.load %arg10[%c2_150, %c0_151, %c0_152] : memref<9x16x8xf32, #tpu.memory_space<vmem>>, vector<1x16x8xf32>
    %254 = vector.shape_cast %253 : vector<1x16x8xf32> to vector<16x8xf32>
    %cst_153 = arith.constant dense<0.000000e+00> : vector<16x256xf32>
    %255 = tpu.matmul %254, %252, %cst_153 {dimension_numbers = #tpu.dot_dimension_numbers<[1], [0], [0], [1], [0, 0, 1, 1], [], []>} : vector<16x8xf32>, vector<8x256xf32>, vector<16x256xf32> -> vector<16x256xf32>
    %256 = arith.addf %248, %255 : vector<16x256xf32>
    %c1_i32_154 = arith.constant 1 : i32
    %257 = tpu.dynamic_rotate %224 by %c1_i32_154 dim 1 : vector<8x256xf32>, i32 -> vector<8x256xf32>
    %258 = vector.extract_strided_slice %0 {offsets = [3, 0], sizes = [1, 256], strides = [1, 1]} : vector<9x256xf32> to vector<1x256xf32>
    %259 = vector.broadcast %258 : vector<1x256xf32> to vector<8x256xf32>
    %260 = arith.mulf %257, %259 : vector<8x256xf32>
    %c3_155 = arith.constant 3 : index
    %c0_156 = arith.constant 0 : index
    %c0_157 = arith.constant 0 : index
    %261 = vector.load %arg10[%c3_155, %c0_156, %c0_157] : memref<9x16x8xf32, #tpu.memory_space<vmem>>, vector<1x16x8xf32>
    %262 = vector.shape_cast %261 : vector<1x16x8xf32> to vector<16x8xf32>
    %cst_158 = arith.constant dense<0.000000e+00> : vector<16x256xf32>
    %263 = tpu.matmul %262, %260, %cst_158 {dimension_numbers = #tpu.dot_dimension_numbers<[1], [0], [0], [1], [0, 0, 1, 1], [], []>} : vector<16x8xf32>, vector<8x256xf32>, vector<16x256xf32> -> vector<16x256xf32>
    %264 = arith.addf %256, %263 : vector<16x256xf32>
    %c4_159 = arith.constant 4 : index
    %c0_160 = arith.constant 0 : index
    %c0_161 = arith.constant 0 : index
    %265 = vector.load %arg10[%c4_159, %c0_160, %c0_161] : memref<9x16x8xf32, #tpu.memory_space<vmem>>, vector<1x16x8xf32>
    %266 = vector.shape_cast %265 : vector<1x16x8xf32> to vector<16x8xf32>
    %cst_162 = arith.constant dense<0.000000e+00> : vector<16x256xf32>
    %267 = tpu.matmul %266, %224, %cst_162 {dimension_numbers = #tpu.dot_dimension_numbers<[1], [0], [0], [1], [0, 0, 1, 1], [], []>} : vector<16x8xf32>, vector<8x256xf32>, vector<16x256xf32> -> vector<16x256xf32>
    %268 = arith.addf %264, %267 : vector<16x256xf32>
    %c255_i32_163 = arith.constant 255 : i32
    %269 = tpu.dynamic_rotate %224 by %c255_i32_163 dim 1 : vector<8x256xf32>, i32 -> vector<8x256xf32>
    %270 = vector.extract_strided_slice %0 {offsets = [5, 0], sizes = [1, 256], strides = [1, 1]} : vector<9x256xf32> to vector<1x256xf32>
    %271 = vector.broadcast %270 : vector<1x256xf32> to vector<8x256xf32>
    %272 = arith.mulf %269, %271 : vector<8x256xf32>
    %c5_164 = arith.constant 5 : index
    %c0_165 = arith.constant 0 : index
    %c0_166 = arith.constant 0 : index
    %273 = vector.load %arg10[%c5_164, %c0_165, %c0_166] : memref<9x16x8xf32, #tpu.memory_space<vmem>>, vector<1x16x8xf32>
    %274 = vector.shape_cast %273 : vector<1x16x8xf32> to vector<16x8xf32>
    %cst_167 = arith.constant dense<0.000000e+00> : vector<16x256xf32>
    %275 = tpu.matmul %274, %272, %cst_167 {dimension_numbers = #tpu.dot_dimension_numbers<[1], [0], [0], [1], [0, 0, 1, 1], [], []>} : vector<16x8xf32>, vector<8x256xf32>, vector<16x256xf32> -> vector<16x256xf32>
    %276 = arith.addf %268, %275 : vector<16x256xf32>
    %c241_i32_168 = arith.constant 241 : i32
    %277 = tpu.dynamic_rotate %224 by %c241_i32_168 dim 1 : vector<8x256xf32>, i32 -> vector<8x256xf32>
    %278 = vector.extract_strided_slice %0 {offsets = [6, 0], sizes = [1, 256], strides = [1, 1]} : vector<9x256xf32> to vector<1x256xf32>
    %279 = vector.broadcast %278 : vector<1x256xf32> to vector<8x256xf32>
    %280 = arith.mulf %277, %279 : vector<8x256xf32>
    %c6_169 = arith.constant 6 : index
    %c0_170 = arith.constant 0 : index
    %c0_171 = arith.constant 0 : index
    %281 = vector.load %arg10[%c6_169, %c0_170, %c0_171] : memref<9x16x8xf32, #tpu.memory_space<vmem>>, vector<1x16x8xf32>
    %282 = vector.shape_cast %281 : vector<1x16x8xf32> to vector<16x8xf32>
    %cst_172 = arith.constant dense<0.000000e+00> : vector<16x256xf32>
    %283 = tpu.matmul %282, %280, %cst_172 {dimension_numbers = #tpu.dot_dimension_numbers<[1], [0], [0], [1], [0, 0, 1, 1], [], []>} : vector<16x8xf32>, vector<8x256xf32>, vector<16x256xf32> -> vector<16x256xf32>
    %284 = arith.addf %276, %283 : vector<16x256xf32>
    %c240_i32_173 = arith.constant 240 : i32
    %285 = tpu.dynamic_rotate %224 by %c240_i32_173 dim 1 : vector<8x256xf32>, i32 -> vector<8x256xf32>
    %286 = vector.extract_strided_slice %0 {offsets = [7, 0], sizes = [1, 256], strides = [1, 1]} : vector<9x256xf32> to vector<1x256xf32>
    %287 = vector.broadcast %286 : vector<1x256xf32> to vector<8x256xf32>
    %288 = arith.mulf %285, %287 : vector<8x256xf32>
    %c7_174 = arith.constant 7 : index
    %c0_175 = arith.constant 0 : index
    %c0_176 = arith.constant 0 : index
    %289 = vector.load %arg10[%c7_174, %c0_175, %c0_176] : memref<9x16x8xf32, #tpu.memory_space<vmem>>, vector<1x16x8xf32>
    %290 = vector.shape_cast %289 : vector<1x16x8xf32> to vector<16x8xf32>
    %cst_177 = arith.constant dense<0.000000e+00> : vector<16x256xf32>
    %291 = tpu.matmul %290, %288, %cst_177 {dimension_numbers = #tpu.dot_dimension_numbers<[1], [0], [0], [1], [0, 0, 1, 1], [], []>} : vector<16x8xf32>, vector<8x256xf32>, vector<16x256xf32> -> vector<16x256xf32>
    %292 = arith.addf %284, %291 : vector<16x256xf32>
    %c239_i32_178 = arith.constant 239 : i32
    %293 = tpu.dynamic_rotate %224 by %c239_i32_178 dim 1 : vector<8x256xf32>, i32 -> vector<8x256xf32>
    %294 = vector.extract_strided_slice %0 {offsets = [8, 0], sizes = [1, 256], strides = [1, 1]} : vector<9x256xf32> to vector<1x256xf32>
    %295 = vector.broadcast %294 : vector<1x256xf32> to vector<8x256xf32>
    %296 = arith.mulf %293, %295 : vector<8x256xf32>
    %c8_179 = arith.constant 8 : index
    %c0_180 = arith.constant 0 : index
    %c0_181 = arith.constant 0 : index
    %297 = vector.load %arg10[%c8_179, %c0_180, %c0_181] : memref<9x16x8xf32, #tpu.memory_space<vmem>>, vector<1x16x8xf32>
    %298 = vector.shape_cast %297 : vector<1x16x8xf32> to vector<16x8xf32>
    %cst_182 = arith.constant dense<0.000000e+00> : vector<16x256xf32>
    %299 = tpu.matmul %298, %296, %cst_182 {dimension_numbers = #tpu.dot_dimension_numbers<[1], [0], [0], [1], [0, 0, 1, 1], [], []>} : vector<16x8xf32>, vector<8x256xf32>, vector<16x256xf32> -> vector<16x256xf32>
    %300 = arith.addf %292, %299 : vector<16x256xf32>
    %cst_183 = arith.constant dense<0.000000e+00> : vector<16x64xf32>
    %301 = tpu.matmul %300, %225, %cst_183 {dimension_numbers = #tpu.dot_dimension_numbers<[1], [0], [0], [1], [0, 0, 1, 1], [], []>} : vector<16x256xf32>, vector<256x64xf32>, vector<16x64xf32> -> vector<16x64xf32>
    %c0_184 = arith.constant 0 : index
    %c0_185 = arith.constant 0 : index
    %302 = vector.load %arg11[%c0_184, %c0_185] : memref<16x1xf32, #tpu.memory_space<vmem>>, vector<16x1xf32>
    %303 = vector.broadcast %302 : vector<16x1xf32> to vector<16x64xf32>
    %304 = arith.addf %301, %303 : vector<16x64xf32>
    %cst_186 = arith.constant 0.000000e+00 : f32
    %305 = vector.broadcast %cst_186 : f32 to vector<16x64xf32>
    %306 = arith.maximumf %304, %305 : vector<16x64xf32>
    %cst_187 = arith.constant 0.000000e+00 : f32
    %307 = vector.broadcast %cst_187 : f32 to vector<16x64xf32>
    %c0_188 = arith.constant 0 : index
    %c0_189 = arith.constant 0 : index
    %c0_190 = arith.constant 0 : index
    %308 = vector.load %arg3[%c0_188, %c0_189, %c0_190] : memref<9x64x64xf32, #tpu.memory_space<vmem>>, vector<1x64x64xf32>
    %309 = vector.shape_cast %308 : vector<1x64x64xf32> to vector<64x64xf32>
    %cst_191 = arith.constant dense<0.000000e+00> : vector<16x64xf32>
    %310 = tpu.matmul %306, %309, %cst_191 {dimension_numbers = #tpu.dot_dimension_numbers<[1], [0], [0], [1], [0, 0, 1, 1], [], []>} : vector<16x64xf32>, vector<64x64xf32>, vector<16x64xf32> -> vector<16x64xf32>
    %c0_192 = arith.constant 0 : index
    %c0_193 = arith.constant 0 : index
    %c0_194 = arith.constant 0 : index
    %311 = vector.load %arg12[%c0_192, %c0_193, %c0_194] : memref<9x16x16xf32, #tpu.memory_space<vmem>>, vector<1x16x16xf32>
    %312 = vector.shape_cast %311 : vector<1x16x16xf32> to vector<16x16xf32>
    %cst_195 = arith.constant dense<0.000000e+00> : vector<16x64xf32>
    %313 = tpu.matmul %312, %310, %cst_195 {dimension_numbers = #tpu.dot_dimension_numbers<[1], [0], [0], [1], [0, 0, 1, 1], [], []>} : vector<16x16xf32>, vector<16x64xf32>, vector<16x64xf32> -> vector<16x64xf32>
    %314 = arith.addf %307, %313 : vector<16x64xf32>
    %c1_196 = arith.constant 1 : index
    %c0_197 = arith.constant 0 : index
    %c0_198 = arith.constant 0 : index
    %315 = vector.load %arg3[%c1_196, %c0_197, %c0_198] : memref<9x64x64xf32, #tpu.memory_space<vmem>>, vector<1x64x64xf32>
    %316 = vector.shape_cast %315 : vector<1x64x64xf32> to vector<64x64xf32>
    %cst_199 = arith.constant dense<0.000000e+00> : vector<16x64xf32>
    %317 = tpu.matmul %306, %316, %cst_199 {dimension_numbers = #tpu.dot_dimension_numbers<[1], [0], [0], [1], [0, 0, 1, 1], [], []>} : vector<16x64xf32>, vector<64x64xf32>, vector<16x64xf32> -> vector<16x64xf32>
    %c1_200 = arith.constant 1 : index
    %c0_201 = arith.constant 0 : index
    %c0_202 = arith.constant 0 : index
    %318 = vector.load %arg12[%c1_200, %c0_201, %c0_202] : memref<9x16x16xf32, #tpu.memory_space<vmem>>, vector<1x16x16xf32>
    %319 = vector.shape_cast %318 : vector<1x16x16xf32> to vector<16x16xf32>
    %cst_203 = arith.constant dense<0.000000e+00> : vector<16x64xf32>
    %320 = tpu.matmul %319, %317, %cst_203 {dimension_numbers = #tpu.dot_dimension_numbers<[1], [0], [0], [1], [0, 0, 1, 1], [], []>} : vector<16x16xf32>, vector<16x64xf32>, vector<16x64xf32> -> vector<16x64xf32>
    %321 = arith.addf %314, %320 : vector<16x64xf32>
    %c2_204 = arith.constant 2 : index
    %c0_205 = arith.constant 0 : index
    %c0_206 = arith.constant 0 : index
    %322 = vector.load %arg3[%c2_204, %c0_205, %c0_206] : memref<9x64x64xf32, #tpu.memory_space<vmem>>, vector<1x64x64xf32>
    %323 = vector.shape_cast %322 : vector<1x64x64xf32> to vector<64x64xf32>
    %cst_207 = arith.constant dense<0.000000e+00> : vector<16x64xf32>
    %324 = tpu.matmul %306, %323, %cst_207 {dimension_numbers = #tpu.dot_dimension_numbers<[1], [0], [0], [1], [0, 0, 1, 1], [], []>} : vector<16x64xf32>, vector<64x64xf32>, vector<16x64xf32> -> vector<16x64xf32>
    %c2_208 = arith.constant 2 : index
    %c0_209 = arith.constant 0 : index
    %c0_210 = arith.constant 0 : index
    %325 = vector.load %arg12[%c2_208, %c0_209, %c0_210] : memref<9x16x16xf32, #tpu.memory_space<vmem>>, vector<1x16x16xf32>
    %326 = vector.shape_cast %325 : vector<1x16x16xf32> to vector<16x16xf32>
    %cst_211 = arith.constant dense<0.000000e+00> : vector<16x64xf32>
    %327 = tpu.matmul %326, %324, %cst_211 {dimension_numbers = #tpu.dot_dimension_numbers<[1], [0], [0], [1], [0, 0, 1, 1], [], []>} : vector<16x16xf32>, vector<16x64xf32>, vector<16x64xf32> -> vector<16x64xf32>
    %328 = arith.addf %321, %327 : vector<16x64xf32>
    %c3_212 = arith.constant 3 : index
    %c0_213 = arith.constant 0 : index
    %c0_214 = arith.constant 0 : index
    %329 = vector.load %arg3[%c3_212, %c0_213, %c0_214] : memref<9x64x64xf32, #tpu.memory_space<vmem>>, vector<1x64x64xf32>
    %330 = vector.shape_cast %329 : vector<1x64x64xf32> to vector<64x64xf32>
    %cst_215 = arith.constant dense<0.000000e+00> : vector<16x64xf32>
    %331 = tpu.matmul %306, %330, %cst_215 {dimension_numbers = #tpu.dot_dimension_numbers<[1], [0], [0], [1], [0, 0, 1, 1], [], []>} : vector<16x64xf32>, vector<64x64xf32>, vector<16x64xf32> -> vector<16x64xf32>
    %c3_216 = arith.constant 3 : index
    %c0_217 = arith.constant 0 : index
    %c0_218 = arith.constant 0 : index
    %332 = vector.load %arg12[%c3_216, %c0_217, %c0_218] : memref<9x16x16xf32, #tpu.memory_space<vmem>>, vector<1x16x16xf32>
    %333 = vector.shape_cast %332 : vector<1x16x16xf32> to vector<16x16xf32>
    %cst_219 = arith.constant dense<0.000000e+00> : vector<16x64xf32>
    %334 = tpu.matmul %333, %331, %cst_219 {dimension_numbers = #tpu.dot_dimension_numbers<[1], [0], [0], [1], [0, 0, 1, 1], [], []>} : vector<16x16xf32>, vector<16x64xf32>, vector<16x64xf32> -> vector<16x64xf32>
    %335 = arith.addf %328, %334 : vector<16x64xf32>
    %c4_220 = arith.constant 4 : index
    %c0_221 = arith.constant 0 : index
    %c0_222 = arith.constant 0 : index
    %336 = vector.load %arg3[%c4_220, %c0_221, %c0_222] : memref<9x64x64xf32, #tpu.memory_space<vmem>>, vector<1x64x64xf32>
    %337 = vector.shape_cast %336 : vector<1x64x64xf32> to vector<64x64xf32>
    %cst_223 = arith.constant dense<0.000000e+00> : vector<16x64xf32>
    %338 = tpu.matmul %306, %337, %cst_223 {dimension_numbers = #tpu.dot_dimension_numbers<[1], [0], [0], [1], [0, 0, 1, 1], [], []>} : vector<16x64xf32>, vector<64x64xf32>, vector<16x64xf32> -> vector<16x64xf32>
    %c4_224 = arith.constant 4 : index
    %c0_225 = arith.constant 0 : index
    %c0_226 = arith.constant 0 : index
    %339 = vector.load %arg12[%c4_224, %c0_225, %c0_226] : memref<9x16x16xf32, #tpu.memory_space<vmem>>, vector<1x16x16xf32>
    %340 = vector.shape_cast %339 : vector<1x16x16xf32> to vector<16x16xf32>
    %cst_227 = arith.constant dense<0.000000e+00> : vector<16x64xf32>
    %341 = tpu.matmul %340, %338, %cst_227 {dimension_numbers = #tpu.dot_dimension_numbers<[1], [0], [0], [1], [0, 0, 1, 1], [], []>} : vector<16x16xf32>, vector<16x64xf32>, vector<16x64xf32> -> vector<16x64xf32>
    %342 = arith.addf %335, %341 : vector<16x64xf32>
    %c5_228 = arith.constant 5 : index
    %c0_229 = arith.constant 0 : index
    %c0_230 = arith.constant 0 : index
    %343 = vector.load %arg3[%c5_228, %c0_229, %c0_230] : memref<9x64x64xf32, #tpu.memory_space<vmem>>, vector<1x64x64xf32>
    %344 = vector.shape_cast %343 : vector<1x64x64xf32> to vector<64x64xf32>
    %cst_231 = arith.constant dense<0.000000e+00> : vector<16x64xf32>
    %345 = tpu.matmul %306, %344, %cst_231 {dimension_numbers = #tpu.dot_dimension_numbers<[1], [0], [0], [1], [0, 0, 1, 1], [], []>} : vector<16x64xf32>, vector<64x64xf32>, vector<16x64xf32> -> vector<16x64xf32>
    %c5_232 = arith.constant 5 : index
    %c0_233 = arith.constant 0 : index
    %c0_234 = arith.constant 0 : index
    %346 = vector.load %arg12[%c5_232, %c0_233, %c0_234] : memref<9x16x16xf32, #tpu.memory_space<vmem>>, vector<1x16x16xf32>
    %347 = vector.shape_cast %346 : vector<1x16x16xf32> to vector<16x16xf32>
    %cst_235 = arith.constant dense<0.000000e+00> : vector<16x64xf32>
    %348 = tpu.matmul %347, %345, %cst_235 {dimension_numbers = #tpu.dot_dimension_numbers<[1], [0], [0], [1], [0, 0, 1, 1], [], []>} : vector<16x16xf32>, vector<16x64xf32>, vector<16x64xf32> -> vector<16x64xf32>
    %349 = arith.addf %342, %348 : vector<16x64xf32>
    %c6_236 = arith.constant 6 : index
    %c0_237 = arith.constant 0 : index
    %c0_238 = arith.constant 0 : index
    %350 = vector.load %arg3[%c6_236, %c0_237, %c0_238] : memref<9x64x64xf32, #tpu.memory_space<vmem>>, vector<1x64x64xf32>
    %351 = vector.shape_cast %350 : vector<1x64x64xf32> to vector<64x64xf32>
    %cst_239 = arith.constant dense<0.000000e+00> : vector<16x64xf32>
    %352 = tpu.matmul %306, %351, %cst_239 {dimension_numbers = #tpu.dot_dimension_numbers<[1], [0], [0], [1], [0, 0, 1, 1], [], []>} : vector<16x64xf32>, vector<64x64xf32>, vector<16x64xf32> -> vector<16x64xf32>
    %c6_240 = arith.constant 6 : index
    %c0_241 = arith.constant 0 : index
    %c0_242 = arith.constant 0 : index
    %353 = vector.load %arg12[%c6_240, %c0_241, %c0_242] : memref<9x16x16xf32, #tpu.memory_space<vmem>>, vector<1x16x16xf32>
    %354 = vector.shape_cast %353 : vector<1x16x16xf32> to vector<16x16xf32>
    %cst_243 = arith.constant dense<0.000000e+00> : vector<16x64xf32>
    %355 = tpu.matmul %354, %352, %cst_243 {dimension_numbers = #tpu.dot_dimension_numbers<[1], [0], [0], [1], [0, 0, 1, 1], [], []>} : vector<16x16xf32>, vector<16x64xf32>, vector<16x64xf32> -> vector<16x64xf32>
    %356 = arith.addf %349, %355 : vector<16x64xf32>
    %c7_244 = arith.constant 7 : index
    %c0_245 = arith.constant 0 : index
    %c0_246 = arith.constant 0 : index
    %357 = vector.load %arg3[%c7_244, %c0_245, %c0_246] : memref<9x64x64xf32, #tpu.memory_space<vmem>>, vector<1x64x64xf32>
    %358 = vector.shape_cast %357 : vector<1x64x64xf32> to vector<64x64xf32>
    %cst_247 = arith.constant dense<0.000000e+00> : vector<16x64xf32>
    %359 = tpu.matmul %306, %358, %cst_247 {dimension_numbers = #tpu.dot_dimension_numbers<[1], [0], [0], [1], [0, 0, 1, 1], [], []>} : vector<16x64xf32>, vector<64x64xf32>, vector<16x64xf32> -> vector<16x64xf32>
    %c7_248 = arith.constant 7 : index
    %c0_249 = arith.constant 0 : index
    %c0_250 = arith.constant 0 : index
    %360 = vector.load %arg12[%c7_248, %c0_249, %c0_250] : memref<9x16x16xf32, #tpu.memory_space<vmem>>, vector<1x16x16xf32>
    %361 = vector.shape_cast %360 : vector<1x16x16xf32> to vector<16x16xf32>
    %cst_251 = arith.constant dense<0.000000e+00> : vector<16x64xf32>
    %362 = tpu.matmul %361, %359, %cst_251 {dimension_numbers = #tpu.dot_dimension_numbers<[1], [0], [0], [1], [0, 0, 1, 1], [], []>} : vector<16x16xf32>, vector<16x64xf32>, vector<16x64xf32> -> vector<16x64xf32>
    %363 = arith.addf %356, %362 : vector<16x64xf32>
    %c8_252 = arith.constant 8 : index
    %c0_253 = arith.constant 0 : index
    %c0_254 = arith.constant 0 : index
    %364 = vector.load %arg3[%c8_252, %c0_253, %c0_254] : memref<9x64x64xf32, #tpu.memory_space<vmem>>, vector<1x64x64xf32>
    %365 = vector.shape_cast %364 : vector<1x64x64xf32> to vector<64x64xf32>
    %cst_255 = arith.constant dense<0.000000e+00> : vector<16x64xf32>
    %366 = tpu.matmul %306, %365, %cst_255 {dimension_numbers = #tpu.dot_dimension_numbers<[1], [0], [0], [1], [0, 0, 1, 1], [], []>} : vector<16x64xf32>, vector<64x64xf32>, vector<16x64xf32> -> vector<16x64xf32>
    %c8_256 = arith.constant 8 : index
    %c0_257 = arith.constant 0 : index
    %c0_258 = arith.constant 0 : index
    %367 = vector.load %arg12[%c8_256, %c0_257, %c0_258] : memref<9x16x16xf32, #tpu.memory_space<vmem>>, vector<1x16x16xf32>
    %368 = vector.shape_cast %367 : vector<1x16x16xf32> to vector<16x16xf32>
    %cst_259 = arith.constant dense<0.000000e+00> : vector<16x64xf32>
    %369 = tpu.matmul %368, %366, %cst_259 {dimension_numbers = #tpu.dot_dimension_numbers<[1], [0], [0], [1], [0, 0, 1, 1], [], []>} : vector<16x16xf32>, vector<16x64xf32>, vector<16x64xf32> -> vector<16x64xf32>
    %370 = arith.addf %363, %369 : vector<16x64xf32>
    %c0_260 = arith.constant 0 : index
    %c0_261 = arith.constant 0 : index
    %371 = vector.load %arg13[%c0_260, %c0_261] : memref<16x1xf32, #tpu.memory_space<vmem>>, vector<16x1xf32>
    %372 = vector.broadcast %371 : vector<16x1xf32> to vector<16x64xf32>
    %373 = arith.addf %370, %372 : vector<16x64xf32>
    %374 = arith.addf %373, %231 : vector<16x64xf32>
    %cst_262 = arith.constant 0.000000e+00 : f32
    %375 = vector.broadcast %cst_262 : f32 to vector<16x64xf32>
    %376 = arith.maximumf %374, %375 : vector<16x64xf32>
    %cst_263 = arith.constant dense<0.000000e+00> : vector<16xf32>
    %377 = vector.multi_reduction <add>, %376, %cst_263 [1] : vector<16x64xf32> to vector<16xf32>
    %378 = vector.shape_cast %377 : vector<16xf32> to vector<16x1xf32>
    %cst_264 = arith.constant 6.400000e+01 : f32
    %379 = vector.broadcast %cst_264 : f32 to vector<16x1xf32>
    %380 = arith.divf %378, %379 : vector<16x1xf32>
    %c0_265 = arith.constant 0 : index
    %c0_266 = arith.constant 0 : index
    %381 = vector.load %arg16[%c0_265, %c0_266] : memref<10x16xf32, #tpu.memory_space<vmem>>, vector<10x16xf32>
    %cst_267 = arith.constant dense<0.000000e+00> : vector<10x1xf32>
    %382 = tpu.matmul %381, %380, %cst_267 {dimension_numbers = #tpu.dot_dimension_numbers<[1], [0], [0], [1], [0, 0, 1, 1], [], []>} : vector<10x16xf32>, vector<16x1xf32>, vector<10x1xf32> -> vector<10x1xf32>
    %c0_268 = arith.constant 0 : index
    %c0_269 = arith.constant 0 : index
    %383 = vector.load %arg17[%c0_268, %c0_269] : memref<10x1xf32, #tpu.memory_space<vmem>>, vector<10x1xf32>
    %384 = arith.addf %382, %383 : vector<10x1xf32>
    %c0_270 = arith.constant 0 : index
    %c0_271 = arith.constant 0 : index
    %385 = vector.load %arg18[%c0_270, %c0_271] : memref<10x1xf32, #tpu.memory_space<vmem>>, vector<10x1xf32>
    tpu.vector_store %arg18[%c0_270, %c0_271], %384 {strides = array<i32>} : memref<10x1xf32, #tpu.memory_space<vmem>>, vector<10x1xf32>,
    return
  }
}

</mosaic_0001>

<bundles_post_ra>
// kernel: resnet_cam_forward.1
= control target key start
LH: loop header
LB: loop body
LE: loop exit
PB: predicated region body
PF: predicated region fallthrough
CT: control target
= control target key end

     0   :  { %v6275_v1 = vmov 0.0   ;;  %s6276_s30 = smov 17   ;;  %s6278_s20 = smov 15   ;;  %v6284_v3 = vmov 0   ;;  %v69_v5 = vlaneseq  ;;  %vm104_vm3 = vcmask 64512   ;;  %s7589_s0 = inlined_call_operand.vmem [shape: f32[8,256], index: 0, kind: input, shape index: {}]   ;;  %s7590_s5 = inlined_call_operand.vmem [shape: f32[8,1], index: 5, kind: input, shape index: {}]   ;;  %s7591_s1 = inlined_call_operand.vmem [shape: f32[9,256], index: 1, kind: input, shape index: {}]   ;;  %s7592_s4 = inlined_call_operand.vmem [shape: f32[9,8,8], index: 4, kind: input, shape index: {}]   ;;  %s7593_s7 = inlined_call_operand.vmem [shape: f32[8,1], index: 7, kind: input, shape index: {}]   ;;  %s7594_s6 = inlined_call_operand.vmem [shape: f32[9,8,8], index: 6, kind: input, shape index: {}]   ;;  %s7595_s9 = inlined_call_operand.vmem [shape: f32[8,1], index: 9, kind: input, shape index: {}]   ;;  %s7596_s8 = inlined_call_operand.vmem [shape: f32[9,8,8], index: 8, kind: input, shape index: {}]   ;;  %s7597_s14 = inlined_call_operand.vmem [shape: f32[16,8], index: 14, kind: input, shape index: {}]   ;;  %s7598_s11 = inlined_call_operand.vmem [shape: f32[16,1], index: 11, kind: input, shape index: {}]   ;;  %s7599_s15 = inlined_call_operand.vmem [shape: f32[16,1], index: 15, kind: input, shape index: {}]   ;;  %s7600_s13 = inlined_call_operand.vmem [shape: f32[16,1], index: 13, kind: input, shape index: {}]   ;;  %s7601_s2 = inlined_call_operand.vmem [shape: f32[256,64], index: 2, kind: input, shape index: {}]   ;;  %s7602_s10 = inlined_call_operand.vmem [shape: f32[9,16,8], index: 10, kind: input, shape index: {}]   ;;  %s7603_s3 = inlined_call_operand.vmem [shape: f32[9,64,64], index: 3, kind: input, shape index: {}]   ;;  %s7604_s12 = inlined_call_operand.vmem [shape: f32[9,16,16], index: 12, kind: input, shape index: {}]   ;;  %s7605_s16 = inlined_call_operand.vmem [shape: f32[10,16], index: 16, kind: input, shape index: {}]   ;;  %s7606_s17 = inlined_call_operand.vmem [shape: f32[10,1], index: 17, kind: input, shape index: {}]   ;;  %s7607_s18 = inlined_call_operand.vmem [shape: f32[10,1], index: 18, kind: output, shape index: {}]  }
   0x1   :  { %7612 = sst [smem:[#allocation2_spill]] %s7589_s0  ;;  %172 = vmatprep.mubr.f32.mxu0 %v6275_v1  ;;  %1071 = vmatprep.mubr.f32.mxu1 %v6275_v1  ;;  %s6277_s0 = smov 16   ;;  %v5265_v30 = vld [vmem:[%s7592_s4 + $0x8] sm:$0xff]  ;;  %v84_v43 = vld [vmem:[%s7592_s4] sm:$0xff]  ;;  %v5268_v48 = vld [vmem:[%s7592_s4 + $0x10] sm:$0xff]  ;;  %vm3621_vm9 = vcmask 523264  }
   0x2   :  { %7613 = sst [smem:[#allocation3_spill]] %s7590_s5  ;;  %s7615_s29 = sld [smem:[#allocation2_spill]]  ;;  %6273 = vset.pattern.permute.xlu0 %v6284_v3  ;;  %6274 = vset.pattern.permute.xlu1 %v6284_v3  ;;  %v6427_v6 = vshrl.u32 %v69_v5, 7  ;;  %v6429_v7 = vand.u32 127, %v69_v5  ;;  %v5270_v54 = vld [vmem:[%s7592_s4 + $0x18] sm:$0xff]  ;;  %vm3792_vm10 = vcmask 130048  }
   0x3   :  { %7614 = sst [smem:[#allocation4_spill]] %s7591_s1  ;;  %s6279_s21 = smov 1   ;;  %vm5259_vm11 = vcmask 1024   ;;  %vm5257_vm12 = vcmask 7168  }
   0x4   :  { %s6280_s22 = smov 127   ;;  %s6281_s1 = smov 113   ;;  %v76_v8 = vsub.s32 0, %v6427_v6  ;;  %v94_v9 = vsub.s32 1, %v6427_v6  ;;  %vm71_vm0 = vcmp.lt.s32.totalorder %v6429_v7, 17  ;;  %vm89_vm1 = vcmp.lt.s32.totalorder %v6429_v7, 16 }
   0x5   :  { %s6282_s23 = smov 112   ;;  %s7610_s24 = smov 111   ;;  %v262_v17 = vsub.s32 2, %v6427_v6  ;;  %vm257_vm2 = vcmp.lt.s32.totalorder %v6429_v7, 15  ;;  %v357_v33 = vsub.s32 3, %v6427_v6  ;;  %vm352_vm4 = vcmp.lt.s32.totalorder %v6429_v7, 1 }
   0x6   :  { %s7616_s27 = sld [smem:[#allocation3_spill]]  ;;  %s7617_s19 = sld [smem:[#allocation4_spill]]  ;;  %v530_v49 = vsub.s32 5, %v6427_v6  ;;  %vm525_vm5 = vcmp.lt.s32.totalorder %v6429_v7, 127  ;;  %v625_v56 = vsub.s32 6, %v6427_v6  ;;  %vm620_vm6 = vcmp.lt.s32.totalorder %v6429_v7, 113 }
   0x7   :  { %v720_v3 = vsub.s32 7, %v6427_v6  ;;  %vm715_vm7 = vcmp.lt.s32.totalorder %v6429_v7, 112  ;;  %vm810_vm8 = vcmp.lt.s32.totalorder %v6429_v7, 111  ;;  %v5347_v7 = vld [vmem:[%s7602_s10 + $0x78] sm:$0xff] }
   0x8   :  { %v6383_v0 = vld [vmem:[%s7615_s29] sm:$0xff]  ;;  %v6394_v2 = vld [vmem:[%s7615_s29 + $0x8] sm:$0xff] }
   0x9   :  { %65 = vrot.lane.b32.xlu1 %v6383_v0, %s6276_s30  ;;  %85 = vrot.lane.b32.xlu0 %v6383_v0, %s6277_s0 }
   0xc   :  { %v901_v4 = vld [vmem:[%s7616_s27] sm:$0xff]  ;;  %v6441_v11 = vld [vmem:[%s7617_s19 + $0x8] sm:$0xff] }
   0xd   :  { %67 = vrot.lane.b32.xlu1 %v6394_v2, %s6276_s30  ;;  %87 = vrot.lane.b32.xlu0 %v6394_v2, %s6277_s0  ;;  %v6436_v10 = vld [vmem:[%s7617_s19] sm:$0xff]  ;;  %v6446_v14 = vrot.slane %v6441_v11, %v76_v8  ;;  %v6449_v15 = vrot.slane %v6441_v11, %v94_v9  ;;  %v6471_v28 = vrot.slane %v6441_v11, %v262_v17 }
   0xe   :  { %v6452_v16 = vrot.slane %v6436_v10, %v94_v9  ;;  %v6456_v18 = vrot.slane %v6436_v10, %v76_v8  ;;  %v6484_v36 = vrot.slane %v6436_v10, %v262_v17  ;;  %v6490_v39 = vrot.slane %v6441_v11, %v357_v33  ;;  %v5274_v17 = vld [vmem:[%s7592_s4 + $0x28] sm:$0xff] }
   0xf   :  { %v6501_v45 = vrot.slane %v6436_v10, %v357_v33  ;;  %v6516_v52 = vrot.slane %v6441_v11, %v530_v49  ;;  %v6529_v59 = vrot.slane %v6436_v10, %v530_v49  ;;  %v6535_v61 = vrot.slane %v6441_v11, %v625_v56 }
  0x10   :  { %v6548_v8 = vrot.slane %v6436_v10, %v625_v56 }
  0x11   :  { %255 = vrot.lane.b32.xlu1 %v6394_v2, %s6278_s20  ;;  %253 = vrot.lane.b32.xlu0 %v6383_v0, %s6278_s20 }
  0x15   :  { %350 = vrot.lane.b32.xlu1 %v6394_v2, %s6279_s21  ;;  %348 = vrot.lane.b32.xlu0 %v6383_v0, %s6279_s21 }
  0x19   :  { %523 = vrot.lane.b32.xlu1 %v6394_v2, %s6280_s22  ;;  %521 = vrot.lane.b32.xlu0 %v6383_v0, %s6280_s22 }
  0x1d   :  { %618 = vrot.lane.b32.xlu1 %v6394_v2, %s6281_s1  ;;  %616 = vrot.lane.b32.xlu0 %v6383_v0, %s6281_s1 }
  0x21   :  { %713 = vrot.lane.b32.xlu1 %v6394_v2, %s6282_s23  ;;  %711 = vrot.lane.b32.xlu0 %v6383_v0, %s6282_s23 }
  0x25   :  { %808 = vrot.lane.b32.xlu1 %v6394_v2, %s7610_s24  ;;  %806 = vrot.lane.b32.xlu0 %v6383_v0, %s7610_s24 }
  0x29   :  { %904 = vperm.xlu0 %6273, %v901_v4  }
  0x7b   :  { %v66_v12 = vpop.permute.xlu1 %65  ;;  %v86_v13 = vpop.permute.xlu0 %85 }
  0x7f   :  { %v68_v19 = vpop.permute.xlu1 %67  ;;  %v88_v20 = vpop.permute.xlu0 %87 }
  0x80   :  { %v72_v21 = vsel %vm71_vm0, %v66_v12, %v68_v19  ;;  %v73_v22 = vsel %vm71_vm0, %v68_v19, %v66_v12  ;;  %v91_v23 = vsel %vm89_vm1, %v88_v20, %v86_v13  ;;  %v90_v24 = vsel %vm89_vm1, %v86_v13, %v88_v20 }
  0x81   :  { %v83_v25 = vmul.f32 %v6446_v14, %v72_v21  ;;  %v101_v26 = vmul.f32 %v6449_v15, %v90_v24  ;;  %v100_v27 = vmul.f32 %v6452_v16, %v91_v23  ;;  %v82_v29 = vmul.f32 %v6456_v18, %v73_v22  ;;  %v6574_v23 = vld [vmem:[%s7617_s19 + $0x18] ss:$0 sm:$0xff] }
  0x82   :  { %v6554_v12 = vrot.slane %v6441_v11, %v720_v3  ;;  %v6566_v11 = vrot.slane %v6436_v10, %v720_v3  ;;  %v5276_v10 = vld [vmem:[%s7592_s4 + $0x30] sm:$0xff] }
  0x83   :  { %108 = vmatprep.subr.mxu0 %v101_v26  ;;  %v256_v31 = vpop.permute.xlu1 %255  ;;  %v254_v32 = vpop.permute.xlu0 %253  ;;  %v5287_v3 = vld [vmem:[%s7594_s6 + $0x10] sm:$0xff] }
  0x84   :  { %109 = vmatpush1.msra.mxu0 %v100_v27  ;;  %v258_v34 = vsel %vm257_vm2, %v254_v32, %v256_v31  ;;  %v259_v37 = vsel %vm257_vm2, %v256_v31, %v254_v32  ;;  %v6588_v27 = vld [vmem:[%s7617_s19 + $0x10] ss:$0 sm:$0xff]  ;;  %v5278_v31 = vld [vmem:[%s7592_s4 + $0x38] sm:$0xff]  ;;  %v5282_v32 = vld [vmem:[%s7592_s4 + $0x40] sm:$0xff] }
  0x85   :  { %5266 = vmatmul.mubr.msk.f32.vlgmr.msra.gmra.mrb[0].mxu0 %vm104_vm3, %v5265_v30  ;;  %182 = vmatprep.subr.mxu0 %v83_v25  ;;  %v269_v35 = vmul.f32 %v6471_v28, %v258_v34  ;;  %v268_v42 = vmul.f32 %v6484_v36, %v259_v37 }
  0x86   :  { %183 = vmatpush1.msra.mxu0 %v82_v29  ;;  %246 = vmatprep.mubr.f32.mxu0 %v6275_v1 }
  0x87   :  { %275 = vmatprep.subr.mxu0 %v269_v35  ;;  %v351_v38 = vpop.permute.xlu1 %350  ;;  %v349_v40 = vpop.permute.xlu0 %348 }
  0x88   :  { %v353_v41 = vsel %vm352_vm4, %v349_v40, %v351_v38  ;;  %v354_v46 = vsel %vm352_vm4, %v351_v38, %v349_v40 }
  0x89   :  { %v364_v44 = vmul.f32 %v6490_v39, %v353_v41  ;;  %v363_v47 = vmul.f32 %v6501_v45, %v354_v46 }
  0x8b   :  { %v524_v50 = vpop.permute.xlu1 %523  ;;  %v522_v51 = vpop.permute.xlu0 %521 }
  0x8c   :  { %v527_v53 = vsel %vm525_vm5, %v524_v50, %v522_v51  ;;  %v526_v60 = vsel %vm525_vm5, %v522_v51, %v524_v50 }
  0x8d   :  { %5267 = vmatmul.mubr.msk.f32.vlgmr.msra.gmra.mrb[0].mxu0 %vm104_vm3, %v84_v43  ;;  %v537_v55 = vmul.f32 %v6516_v52, %v527_v53  ;;  %v536_v63 = vmul.f32 %v6529_v59, %v526_v60  ;;  %v919_v53 = vld [vmem:[%s7594_s6] sm:$0xff] }
  0x8e   :  { %276 = vmatpush1.msra.mxu0 %v268_v42  ;;  %339 = vmatprep.mubr.f32.mxu0 %v6275_v1  ;;  %v1672_v42 = vld [vmem:[%s7593_s7] sm:$0xff] }
  0x8f   :  { %370 = vmatprep.subr.mxu0 %v364_v44  ;;  %v619_v57 = vpop.permute.xlu1 %618  ;;  %v617_v58 = vpop.permute.xlu0 %616 }
  0x90   :  { %v622_v62 = vsel %vm620_vm6, %v619_v57, %v617_v58  ;;  %v621_v9 = vsel %vm620_vm6, %v617_v58, %v619_v57 }
  0x91   :  { %v631_v13 = vmul.f32 %v6548_v8, %v621_v9 }
  0x93   :  { %v714_v4 = vpop.permute.xlu1 %713  ;;  %v712_v5 = vpop.permute.xlu0 %711 }
  0x94   :  { %v717_v6 = vsel %vm715_vm7, %v714_v4, %v712_v5  ;;  %v716_v22 = vsel %vm715_vm7, %v712_v5, %v714_v4 }
  0x95   :  { %5269 = vmatmul.mubr.msk.f32.vlgmr.msra.gmra.mrb[0].mxu0 %vm104_vm3, %v5268_v48  ;;  %v727_v19 = vmul.f32 %v6554_v12, %v717_v6  ;;  %v726_v25 = vmul.f32 %v6566_v11, %v716_v22 }
  0x96   :  { %371 = vmatpush1.msra.mxu0 %v363_v47  ;;  %434 = vmatprep.mubr.f32.mxu0 %v6275_v1 }
  0x97   :  { %448 = vmatprep.subr.mxu0 %v6394_v2  ;;  %v632_v2 = vmul.f32 %v6535_v61, %v622_v62  ;;  %v809_v20 = vpop.permute.xlu1 %808  ;;  %v807_v21 = vpop.permute.xlu0 %806 }
  0x98   :  { %v812_v24 = vsel %vm810_vm8, %v809_v20, %v807_v21  ;;  %v811_v29 = vsel %vm810_vm8, %v807_v21, %v809_v20 }
  0x99   :  { %v822_v26 = vmul.f32 %v6574_v23, %v812_v24  ;;  %v821_v30 = vmul.f32 %v6588_v27, %v811_v29 }
  0x9d   :  { %5271 = vmatmul.mubr.msk.f32.vlgmr.msra.gmra.mrb[0].mxu0 %vm104_vm3, %v5270_v54 }
  0x9e   :  { %449 = vmatpush1.msra.mxu0 %v6383_v0  ;;  %512 = vmatprep.mubr.f32.mxu0 %v6275_v1  ;;  %v5272_v0 = vld [vmem:[%s7592_s4 + $0x20] sm:$0xff]  ;;  %s7618_s4 = smov 111  }
  0x9f   :  { %543 = vmatprep.subr.mxu0 %v537_v55 }
  0xa5   :  { %5273 = vmatmul.mubr.msk.f32.vlgmr.msra.gmra.mrb[0].mxu0 %vm104_vm3, %v5272_v0 }
  0xa6   :  { %544 = vmatpush1.msra.mxu0 %v536_v63  ;;  %607 = vmatprep.mubr.f32.mxu0 %v6275_v1 }
  0xa7   :  { %638 = vmatprep.subr.mxu0 %v632_v2 }
  0xa8   :  { %v905_v33 = vpop.permute.xlu0 %904 }
  0xad   :  { %5275 = vmatmul.mubr.msk.f32.vlgmr.msra.gmra.mrb[0].mxu0 %vm104_vm3, %v5274_v17 }
  0xae   :  { %639 = vmatpush1.msra.mxu0 %v631_v13  ;;  %702 = vmatprep.mubr.f32.mxu0 %v6275_v1 }
  0xaf   :  { %733 = vmatprep.subr.mxu0 %v727_v19  ;;  %v5289_v19 = vld [vmem:[%s7594_s6 + $0x18] sm:$0xff] }
  0xb5   :  { %5277 = vmatmul.mubr.msk.f32.vlgmr.msra.gmra.mrb[0].mxu0 %vm104_vm3, %v5276_v10 }
  0xb6   :  { %734 = vmatpush1.msra.mxu0 %v726_v25  ;;  %797 = vmatprep.mubr.f32.mxu0 %v6275_v1 }
  0xb7   :  { %828 = vmatprep.subr.mxu0 %v822_v26 }
  0xbd   :  { %5279 = vmatmul.mubr.msk.f32.vlgmr.msra.gmra.mrb[0].mxu0 %vm104_vm3, %v5278_v31 }
  0xbe   :  { %829 = vmatpush1.msra.mxu0 %v821_v30  ;;  %892 = vmatprep.mubr.f32.mxu0 %v6275_v1 }
  0xc5   :  { %5283 = vmatmul.mubr.msk.f32.vlgmr.msra.gmra.mrb[0].mxu0 %vm104_vm3, %v5282_v32  ;;  %v5291_v32 = vld [vmem:[%s7594_s6 + $0x20] sm:$0xff] }
  0xc6   :  { %997 = vmatprep.mubr.f32.mxu0 %v6275_v1 }
 0x198   :  { %v894_v34 = vpop.f32.mrb[0].mxu0 }
 0x199   :  { %v907_v35 = vadd.f32 %v905_v33, %v894_v34  ;;  %v896_v37 = vpop.f32.mrb[1].mxu0 }
 0x19a   :  { %v908_v40 = vadd.f32 %v905_v33, %v896_v37  ;;  %v5284_v33 = vld [vmem:[%s7594_s6 + $0x8] sm:$0xff] }
 0x19b   :  { %v6603_v38 = vmax.f32 %v907_v35, 0.0 }
 0x19c   :  { %v6609_v41 = vmax.f32 %v908_v40, 0.0 }
 0x19d   :  { %1078 = vrot.lane.b32.xlu0 %v6603_v38, %s6278_s20  ;;  %911 = vrot.lane.b32.xlu1 %v6603_v38, %s6276_s30 }
 0x1a1   :  { %1164 = vrot.lane.b32.xlu0 %v6603_v38, %s6279_s21  ;;  %913 = vrot.lane.b32.xlu1 %v6609_v41, %s6276_s30 }
 0x1a5   :  { %1328 = vrot.lane.b32.xlu0 %v6603_v38, %s6280_s22  ;;  %1080 = vrot.lane.b32.xlu1 %v6609_v41, %s6278_s20 }
 0x1a9   :  { %1414 = vrot.lane.b32.xlu0 %v6603_v38, %s6281_s1  ;;  %1166 = vrot.lane.b32.xlu1 %v6609_v41, %s6279_s21 }
 0x1ad   :  { %1500 = vrot.lane.b32.xlu0 %v6603_v38, %s6282_s23  ;;  %1330 = vrot.lane.b32.xlu1 %v6609_v41, %s6280_s22 }
 0x1b1   :  { %920 = vrot.lane.b32.xlu0 %v6603_v38, %s6277_s0  ;;  %1416 = vrot.lane.b32.xlu1 %v6609_v41, %s6281_s1 }
 0x1b5   :  { %1586 = vrot.lane.b32.xlu0 %v6603_v38, %s7618_s4  ;;  %1502 = vrot.lane.b32.xlu1 %v6609_v41, %s6282_s23 }
 0x1b9   :  { %1675 = vperm.xlu0 %6273, %v1672_v42   ;;  %922 = vrot.lane.b32.xlu1 %v6609_v41, %s6277_s0  ;;  %v5293_v42 = vld [vmem:[%s7594_s6 + $0x28] sm:$0xff] }
 0x1bd   :  { %1588 = vrot.lane.b32.xlu1 %v6609_v41, %s7618_s4 }
 0x20f   :  { %v1079_v43 = vpop.permute.xlu0 %1078  ;;  %v912_v44 = vpop.permute.xlu1 %911 }
 0x213   :  { %v1165_v46 = vpop.permute.xlu0 %1164  ;;  %v914_v47 = vpop.permute.xlu1 %913 }
 0x214   :  { %v916_v48 = vsel %vm71_vm0, %v914_v47, %v912_v44  ;;  %v915_v49 = vsel %vm71_vm0, %v912_v44, %v914_v47 }
 0x215   :  { %v918_v50 = vmul.f32 %v915_v49, %v6446_v14  ;;  %v917_v51 = vmul.f32 %v916_v48, %v6456_v18 }
 0x217   :  { %1007 = vmatprep.subr.mxu1 %v918_v50  ;;  %v1081_v54 = vpop.permute.xlu1 %1080  ;;  %v1329_v57 = vpop.permute.xlu0 %1328  ;;  %v5295_v50 = vld [vmem:[%s7594_s6 + $0x30] sm:$0xff] }
 0x218   :  { %v1082_v55 = vsel %vm257_vm2, %v1079_v43, %v1081_v54  ;;  %v1083_v56 = vsel %vm257_vm2, %v1081_v54, %v1079_v43  ;;  %1008 = vmatpush1.msra.mxu1 %v917_v51 }
 0x219   :  { %v1084_v58 = vmul.f32 %v1083_v56, %v6484_v36  ;;  %v1085_v60 = vmul.f32 %v1082_v55, %v6471_v28  ;;  %5286 = vmatmul.mubr.msk.f32.vlgmr.msra.gmra.mrb[0].mxu1 %vm104_vm3, %v919_v53  ;;  %v5297_v55 = vld [vmem:[%s7594_s6 + $0x38] sm:$0xff] }
 0x21a   :  { %1155 = vmatprep.mubr.f32.mxu1 %v6275_v1 }
 0x21b   :  { %1091 = vmatprep.subr.mxu1 %v1085_v60  ;;  %v1167_v62 = vpop.permute.xlu1 %1166  ;;  %v1415_v4 = vpop.permute.xlu0 %1414 }
 0x21c   :  { %v1168_v63 = vsel %vm352_vm4, %v1165_v46, %v1167_v62  ;;  %1092 = vmatpush1.msra.mxu1 %v1084_v58  ;;  %v1169_v0 = vsel %vm352_vm4, %v1167_v62, %v1165_v46 }
 0x21d   :  { %v1171_v2 = vmul.f32 %v1168_v63, %v6490_v39  ;;  %v1170_v9 = vmul.f32 %v1169_v0, %v6501_v45 }
 0x21f   :  { %1177 = vmatprep.subr.mxu1 %v1171_v2  ;;  %v1331_v5 = vpop.permute.xlu1 %1330  ;;  %v1501_v13 = vpop.permute.xlu0 %1500 }
 0x220   :  { %v1333_v17 = vsel %vm525_vm5, %v1331_v5, %v1329_v57  ;;  %v1332_v26 = vsel %vm525_vm5, %v1329_v57, %v1331_v5  ;;  %v5299_v57 = vld [vmem:[%s7594_s6 + $0x40] sm:$0xff] }
 0x221   :  { %5288 = vmatmul.mubr.msk.f32.vlgmr.msra.gmra.mrb[0].mxu1 %vm104_vm3, %v5287_v3  ;;  %v1335_v21 = vmul.f32 %v1333_v17, %v6516_v52  ;;  %v1334_v34 = vmul.f32 %v1332_v26, %v6529_v59 }
 0x222   :  { %1178 = vmatpush1.msra.mxu1 %v1170_v9  ;;  %1241 = vmatprep.mubr.f32.mxu1 %v6275_v1 }
 0x223   :  { %1255 = vmatprep.subr.mxu1 %v6609_v41  ;;  %v1417_v6 = vpop.permute.xlu1 %1416  ;;  %v921_v22 = vpop.permute.xlu0 %920 }
 0x224   :  { %v1419_v31 = vsel %vm620_vm6, %v1417_v6, %v1415_v4  ;;  %v1418_v37 = vsel %vm620_vm6, %v1415_v4, %v1417_v6 }
 0x225   :  { %v1421_v35 = vmul.f32 %v1419_v31, %v6535_v61  ;;  %v1420_v43 = vmul.f32 %v1418_v37, %v6548_v8 }
 0x227   :  { %v1503_v20 = vpop.permute.xlu1 %1502  ;;  %v1587_v47 = vpop.permute.xlu0 %1586 }
 0x228   :  { %v1505_v40 = vsel %vm715_vm7, %v1503_v20, %v1501_v13  ;;  %v1504_v48 = vsel %vm715_vm7, %v1501_v13, %v1503_v20  ;;  %v2443_v13 = vld [vmem:[%s7595_s9] sm:$0xff] }
 0x229   :  { %5290 = vmatmul.mubr.msk.f32.vlgmr.msra.gmra.mrb[0].mxu1 %vm104_vm3, %v5289_v19  ;;  %v1507_v44 = vmul.f32 %v1505_v40, %v6554_v12  ;;  %v1506_v51 = vmul.f32 %v1504_v48, %v6566_v11 }
 0x22a   :  { %1256 = vmatpush1.msra.mxu1 %v6603_v38  ;;  %1319 = vmatprep.mubr.f32.mxu1 %v6275_v1 }
 0x22b   :  { %1341 = vmatprep.subr.mxu1 %v1335_v21  ;;  %v923_v24 = vpop.permute.xlu1 %922 }
 0x22c   :  { %v924_v25 = vsel %vm89_vm1, %v921_v22, %v923_v24  ;;  %v925_v10 = vsel %vm89_vm1, %v923_v24, %v921_v22 }
 0x22d   :  { %v926_v29 = vmul.f32 %v925_v10, %v6452_v16  ;;  %v927_v30 = vmul.f32 %v924_v25, %v6449_v15  ;;  %v5301_v10 = vld [vmem:[%s7596_s8 + $0x8] sm:$0xff] }
 0x22f   :  { %933 = vmatprep.subr.mxu0 %v927_v30  ;;  %v1589_v46 = vpop.permute.xlu1 %1588 }
 0x230   :  { %934 = vmatpush1.msra.mxu0 %v926_v29  ;;  %v1591_v49 = vsel %vm810_vm8, %v1589_v46, %v1587_v47  ;;  %v1590_v54 = vsel %vm810_vm8, %v1587_v47, %v1589_v46 }
 0x231   :  { %5292 = vmatmul.mubr.msk.f32.vlgmr.msra.gmra.mrb[0].mxu1 %vm104_vm3, %v5291_v32  ;;  %5285 = vmatmul.mubr.msk.f32.vlgmr.msra.gmra.mrb[2].mxu0 %vm104_vm3, %v5284_v33  ;;  %v1593_v53 = vmul.f32 %v6574_v23, %v1591_v49  ;;  %v1592_v56 = vmul.f32 %v6588_v27, %v1590_v54 }
 0x232   :  { %1342 = vmatpush1.msra.mxu1 %v1334_v34  ;;  %1405 = vmatprep.mubr.f32.mxu1 %v6275_v1 }
 0x233   :  { %1427 = vmatprep.subr.mxu1 %v1421_v35  ;;  %1768 = vmatprep.mubr.f32.mxu0 %v6275_v1 }
 0x238   :  { %v1676_v2 = vpop.permute.xlu0 %1675 }
 0x239   :  { %5294 = vmatmul.mubr.msk.f32.vlgmr.msra.gmra.mrb[0].mxu1 %vm104_vm3, %v5293_v42 }
 0x23a   :  { %1428 = vmatpush1.msra.mxu1 %v1420_v43  ;;  %1491 = vmatprep.mubr.f32.mxu1 %v6275_v1  ;;  %v1690_v43 = vld [vmem:[%s7596_s8] sm:$0xff] }
 0x23b   :  { %1513 = vmatprep.subr.mxu1 %v1507_v44 }
 0x241   :  { %5296 = vmatmul.mubr.msk.f32.vlgmr.msra.gmra.mrb[0].mxu1 %vm104_vm3, %v5295_v50  ;;  %v5304_v50 = vld [vmem:[%s7596_s8 + $0x10] sm:$0xff] }
 0x242   :  { %1514 = vmatpush1.msra.mxu1 %v1506_v51  ;;  %1577 = vmatprep.mubr.f32.mxu1 %v6275_v1 }
 0x243   :  { %1599 = vmatprep.subr.mxu1 %v1593_v53 }
 0x249   :  { %5298 = vmatmul.mubr.msk.f32.vlgmr.msra.gmra.mrb[0].mxu1 %vm104_vm3, %v5297_v55 }
 0x24a   :  { %1600 = vmatpush1.msra.mxu1 %v1592_v56  ;;  %1663 = vmatprep.mubr.f32.mxu1 %v6275_v1  ;;  %v5306_v56 = vld [vmem:[%s7596_s8 + $0x18] sm:$0xff] }
 0x251   :  { %5300 = vmatmul.mubr.msk.f32.vlgmr.msra.gmra.mrb[0].mxu1 %vm104_vm3, %v5299_v57 }
 0x252   :  { %2559 = vmatprep.mubr.f32.mxu1 %v6275_v1 }
 0x304   :  { %v999_v58 = vpop.f32.mrb[2].mxu0 }
 0x305   :  { %v1001_v60 = vpop.f32.mrb[3].mxu0 }
 0x324   :  { %v1665_v62 = vpop.f32.mrb[0].mxu1 }
 0x325   :  { %v6167_v63 = vadd.f32 %v1665_v62, %v999_v58  ;;  %v1667_v0 = vpop.f32.mrb[1].mxu1 }
 0x326   :  { %v6168_v3 = vadd.f32 %v1667_v0, %v1001_v60  ;;  %v5308_v0 = vld [vmem:[%s7596_s8 + $0x20] sm:$0xff] }
 0x327   :  { %v1678_v4 = vadd.f32 %v6167_v63, %v1676_v2 }
 0x328   :  { %v1679_v5 = vadd.f32 %v6168_v3, %v1676_v2 }
 0x329   :  { %v6737_v9 = vmax.f32 %v1678_v4, 0.0 }
 0x32a   :  { %v6739_v6 = vmax.f32 %v1679_v5, 0.0 }
 0x32b   :  { %1691 = vrot.lane.b32.xlu1 %v6737_v9, %s6277_s0 }
 0x32c   :  { %1693 = vrot.lane.b32.xlu0 %v6739_v6, %s6277_s0 }
 0x32f   :  { %1682 = vrot.lane.b32.xlu1 %v6737_v9, %s6276_s30 }
 0x330   :  { %1684 = vrot.lane.b32.xlu0 %v6739_v6, %s6276_s30 }
 0x333   :  { %1849 = vrot.lane.b32.xlu1 %v6737_v9, %s6278_s20 }
 0x334   :  { %1851 = vrot.lane.b32.xlu0 %v6739_v6, %s6278_s20 }
 0x337   :  { %1935 = vrot.lane.b32.xlu1 %v6737_v9, %s6279_s21 }
 0x338   :  { %1937 = vrot.lane.b32.xlu0 %v6739_v6, %s6279_s21 }
 0x33b   :  { %2099 = vrot.lane.b32.xlu1 %v6737_v9, %s6280_s22 }
 0x33c   :  { %2101 = vrot.lane.b32.xlu0 %v6739_v6, %s6280_s22 }
 0x33f   :  { %2185 = vrot.lane.b32.xlu1 %v6737_v9, %s6281_s1 }
 0x340   :  { %2187 = vrot.lane.b32.xlu0 %v6739_v6, %s6281_s1 }
 0x343   :  { %2271 = vrot.lane.b32.xlu1 %v6737_v9, %s6282_s23 }
 0x344   :  { %2273 = vrot.lane.b32.xlu0 %v6739_v6, %s6282_s23 }
 0x347   :  { %2357 = vrot.lane.b32.xlu1 %v6737_v9, %s7618_s4 }
 0x348   :  { %2359 = vrot.lane.b32.xlu0 %v6739_v6, %s7618_s4 }
 0x34b   :  { %2446 = vperm.xlu1 %6274, %v2443_v13   ;;  %v5310_v13 = vld [vmem:[%s7596_s8 + $0x28] sm:$0xff] }
 0x39d   :  { %v1692_v17 = vpop.permute.xlu1 %1691 }
 0x39e   :  { %v1694_v19 = vpop.permute.xlu0 %1693 }
 0x39f   :  { %v1695_v20 = vsel %vm89_vm1, %v1692_v17, %v1694_v19  ;;  %v1696_v21 = vsel %vm89_vm1, %v1694_v19, %v1692_v17 }
 0x3a0   :  { %v1697_v22 = vmul.f32 %v1696_v21, %v6452_v16  ;;  %v1698_v24 = vmul.f32 %v1695_v20, %v6449_v15 }
 0x3a1   :  { %v1683_v25 = vpop.permute.xlu1 %1682 }
 0x3a2   :  { %1704 = vmatprep.subr.mxu0 %v1698_v24  ;;  %v1685_v26 = vpop.permute.xlu0 %1684 }
 0x3a3   :  { %v1686_v29 = vsel %vm71_vm0, %v1683_v25, %v1685_v26  ;;  %v1687_v30 = vsel %vm71_vm0, %v1685_v26, %v1683_v25  ;;  %1705 = vmatpush1.msra.mxu0 %v1697_v22  ;;  %v5312_v25 = vld [vmem:[%s7596_s8 + $0x30] sm:$0xff] }
 0x3a4   :  { %v1688_v31 = vmul.f32 %v1687_v30, %v6456_v18  ;;  %v1689_v32 = vmul.f32 %v1686_v29, %v6446_v14  ;;  %5302 = vmatmul.mubr.msk.f32.vlgmr.msra.gmra.mrb[4].mxu0 %vm104_vm3, %v5301_v10  ;;  %v5314_v30 = vld [vmem:[%s7596_s8 + $0x38] sm:$0xff] }
 0x3a5   :  { %v1850_v33 = vpop.permute.xlu1 %1849  ;;  %1842 = vmatprep.mubr.f32.mxu0 %v6275_v1 }
 0x3a6   :  { %1778 = vmatprep.subr.mxu0 %v1689_v32  ;;  %v1852_v34 = vpop.permute.xlu0 %1851  ;;  %v5316_v32 = vld [vmem:[%s7596_s8 + $0x40] sm:$0xff] }
 0x3a7   :  { %v1853_v35 = vsel %vm257_vm2, %v1850_v33, %v1852_v34  ;;  %1779 = vmatpush1.msra.mxu0 %v1688_v31  ;;  %v1854_v37 = vsel %vm257_vm2, %v1852_v34, %v1850_v33 }
 0x3a8   :  { %v1856_v40 = vmul.f32 %v1853_v35, %v6471_v28  ;;  %v1855_v46 = vmul.f32 %v1854_v37, %v6484_v36 }
 0x3a9   :  { %v1936_v42 = vpop.permute.xlu1 %1935 }
 0x3aa   :  { %1862 = vmatprep.subr.mxu0 %v1856_v40  ;;  %v1938_v44 = vpop.permute.xlu0 %1937 }
 0x3ab   :  { %v1939_v47 = vsel %vm352_vm4, %v1936_v42, %v1938_v44  ;;  %v1940_v49 = vsel %vm352_vm4, %v1938_v44, %v1936_v42 }
 0x3ac   :  { %v1942_v48 = vmul.f32 %v1939_v47, %v6490_v39  ;;  %5303 = vmatmul.mubr.msk.f32.vlgmr.msra.gmra.mrb[4].mxu0 %vm104_vm3, %v1690_v43  ;;  %v1941_v51 = vmul.f32 %v1940_v49, %v6501_v45  ;;  %v2487_v47 = vld [vmem:[%s7597_s14] sm:$0xff] }
 0x3ad   :  { %1863 = vmatpush1.msra.mxu0 %v1855_v46  ;;  %1926 = vmatprep.mubr.f32.mxu0 %v6275_v1  ;;  %v2100_v53 = vpop.permute.xlu1 %2099  ;;  %v2572_v49 = vld [vmem:[%s7599_s15] sm:$0xff] }
 0x3ae   :  { %1948 = vmatprep.subr.mxu0 %v1942_v48  ;;  %v2102_v54 = vpop.permute.xlu0 %2101  ;;  %v3525_v48 = vld [vmem:[%s7598_s11 + $0x8] sm:$0xff] }
 0x3af   :  { %v2104_v55 = vsel %vm525_vm5, %v2102_v54, %v2100_v53  ;;  %v2103_v62 = vsel %vm525_vm5, %v2100_v53, %v2102_v54  ;;  %v5146_v53 = vld [vmem:[%s7600_s13 + $0x8] sm:$0xff]  ;;  %v2471_v54 = vld [vmem:[%s7601_s2 + $0x80] sm:$0xff] }
 0x3b0   :  { %v2106_v57 = vmul.f32 %v2104_v55, %v6516_v52  ;;  %v2105_v2 = vmul.f32 %v2103_v62, %v6529_v59  ;;  %v2472_v55 = vld [vmem:[%s7601_s2 + $0x88] sm:$0xff]  ;;  %v2473_v62 = vld [vmem:[%s7601_s2 + $0x90] sm:$0xff] }
 0x3b1   :  { %v2186_v58 = vpop.permute.xlu1 %2185 }
 0x3b2   :  { %v2188_v60 = vpop.permute.xlu0 %2187 }
 0x3b3   :  { %v2190_v63 = vsel %vm620_vm6, %v2188_v60, %v2186_v58 }
 0x3b4   :  { %5305 = vmatmul.mubr.msk.f32.vlgmr.msra.gmra.mrb[4].mxu0 %vm104_vm3, %v5304_v50  ;;  %v2192_v3 = vmul.f32 %v2190_v63, %v6535_v61  ;;  %v2573_v50 = vld [vmem:[%s7599_s15 + $0x8] sm:$0xff]  ;;  %v2474_v63 = vld [vmem:[%s7601_s2 + $0x98] sm:$0xff] }
 0x3b5   :  { %1949 = vmatpush1.msra.mxu0 %v1941_v51  ;;  %2012 = vmatprep.mubr.f32.mxu0 %v6275_v1  ;;  %v2272_v4 = vpop.permute.xlu1 %2271  ;;  %v5145_v51 = vld [vmem:[%s7600_s13] sm:$0xff] }
 0x3b6   :  { %2026 = vmatprep.subr.mxu0 %v6739_v6  ;;  %v2274_v5 = vpop.permute.xlu0 %2273 }
 0x3b7   :  { %v2276_v6 = vsel %vm715_vm7, %v2274_v5, %v2272_v4  ;;  %v2275_v22 = vsel %vm715_vm7, %v2272_v4, %v2274_v5  ;;  %v2475_v5 = vld [vmem:[%s7601_s2 + $0xa0] sm:$0xff] }
 0x3b8   :  { %v2278_v19 = vmul.f32 %v2276_v6, %v6554_v12  ;;  %v2277_v10 = vmul.f32 %v2275_v22, %v6566_v11  ;;  %v2459_v6 = vld [vmem:[%s7601_s2 + $0x20] sm:$0xff] }
 0x3b9   :  { %v2358_v20 = vpop.permute.xlu1 %2357 }
 0x3ba   :  { %v2360_v21 = vpop.permute.xlu0 %2359 }
 0x3bb   :  { %v2362_v24 = vsel %vm810_vm8, %v2360_v21, %v2358_v20  ;;  %v2361_v29 = vsel %vm810_vm8, %v2358_v20, %v2360_v21  ;;  %v2478_v20 = vld [vmem:[%s7601_s2 + $0xb8] sm:$0xff] }
 0x3bc   :  { %5307 = vmatmul.mubr.msk.f32.vlgmr.msra.gmra.mrb[4].mxu0 %vm104_vm3, %v5306_v56  ;;  %v2364_v26 = vmul.f32 %v6574_v23, %v2362_v24  ;;  %v2363_v31 = vmul.f32 %v6588_v27, %v2361_v29  ;;  %v5919_v56 = vpack.c.bf16 %v2472_v55, %v2471_v54  ;;  %v2461_v24 = vld [vmem:[%s7601_s2 + $0x30] sm:$0xff] }
 0x3bd   :  { %2027 = vmatpush1.msra.mxu0 %v6737_v9  ;;  %2090 = vmatprep.mubr.f32.mxu0 %v6275_v1  ;;  %v2189_v9 = vsel %vm620_vm6, %v2186_v58, %v2188_v60  ;;  %v2456_v58 = vld [vmem:[%s7601_s2 + $0x8] sm:$0xff]  ;;  %v2469_v55 = vld [vmem:[%s7601_s2 + $0x70] sm:$0xff] }
 0x3be   :  { %2112 = vmatprep.subr.mxu0 %v2106_v57  ;;  %v2191_v17 = vmul.f32 %v2189_v9, %v6548_v8  ;;  %v2455_v57 = vld [vmem:[%s7601_s2] sm:$0xff]  ;;  %v2476_v9 = vld [vmem:[%s7601_s2 + $0xa8] sm:$0xff] }
 0x3bf   :  { %v6950_v60 = vpack.c.bf16 %v2456_v58, %v2455_v57  ;;  %v2470_v57 = vld [vmem:[%s7601_s2 + $0x78] sm:$0xff] }
 0x3c0   :  { %v7076_v58 = vpack.c.bf16 %v2470_v57, %v2469_v55 }
 0x3c4   :  { %5309 = vmatmul.mubr.msk.f32.vlgmr.msra.gmra.mrb[4].mxu0 %vm104_vm3, %v5308_v0  ;;  %v6959_v0 = vpack.c.bf16 %v2474_v63, %v2473_v62 }
 0x3c5   :  { %2113 = vmatpush1.msra.mxu0 %v2105_v2  ;;  %2176 = vmatprep.mubr.f32.mxu0 %v6275_v1  ;;  %v2457_v2 = vld [vmem:[%s7601_s2 + $0x10] sm:$0xff] }
 0x3c6   :  { %2198 = vmatprep.subr.mxu0 %v2192_v3  ;;  %v2458_v3 = vld [vmem:[%s7601_s2 + $0x18] sm:$0xff] }
 0x3c7   :  { %v6968_v4 = vpack.c.bf16 %v2458_v3, %v2457_v2 }
 0x3ca   :  { %v2447_v33 = vpop.permute.xlu1 %2446 }
 0x3cc   :  { %5311 = vmatmul.mubr.msk.f32.vlgmr.msra.gmra.mrb[4].mxu0 %vm104_vm3, %v5310_v13  ;;  %v6979_v13 = vpack.c.bf16 %v2476_v9, %v2475_v5 }
 0x3cd   :  { %2199 = vmatpush1.msra.mxu0 %v2191_v17  ;;  %2262 = vmatprep.mubr.f32.mxu0 %v6275_v1  ;;  %v2460_v17 = vld [vmem:[%s7601_s2 + $0x28] sm:$0xff] }
 0x3ce   :  { %2284 = vmatprep.subr.mxu0 %v2278_v19  ;;  %v2477_v19 = vld [vmem:[%s7601_s2 + $0xb0] sm:$0xff]  ;;  %v6991_v21 = vpack.c.bf16 %v2460_v17, %v2459_v6 }
 0x3cf   :  { %v6994_v22 = vpack.c.bf16 %v2478_v20, %v2477_v19  ;;  %v5320_v17 = vld [vmem:[%s7602_s10 + $0x10] sm:$0xff] }
 0x3d4   :  { %5313 = vmatmul.mubr.msk.f32.vlgmr.msra.gmra.mrb[4].mxu0 %vm104_vm3, %v5312_v25  ;;  %v2462_v25 = vld [vmem:[%s7601_s2 + $0x38] sm:$0xff] }
 0x3d5   :  { %2285 = vmatpush1.msra.mxu0 %v2277_v10  ;;  %2348 = vmatprep.mubr.f32.mxu0 %v6275_v1  ;;  %v2479_v10 = vld [vmem:[%s7601_s2 + $0xc0] sm:$0xff]  ;;  %v7009_v29 = vpack.c.bf16 %v2462_v25, %v2461_v24  ;;  %v5321_v25 = vld [vmem:[%s7602_s10 + $0x18] sm:$0xff] }
 0x3d6   :  { %2370 = vmatprep.subr.mxu0 %v2364_v26  ;;  %v2480_v26 = vld [vmem:[%s7601_s2 + $0xc8] sm:$0xff] }
 0x3dc   :  { %5315 = vmatmul.mubr.msk.f32.vlgmr.msra.gmra.mrb[4].mxu0 %vm104_vm3, %v5314_v30  ;;  %v7012_v30 = vpack.c.bf16 %v2480_v26, %v2479_v10 }
 0x3dd   :  { %2371 = vmatpush1.msra.mxu0 %v2363_v31  ;;  %2434 = vmatprep.mubr.f32.mxu0 %v6275_v1  ;;  %v2463_v31 = vld [vmem:[%s7601_s2 + $0x40] sm:$0xff] }
 0x3e4   :  { %5317 = vmatmul.mubr.msk.f32.vlgmr.msra.gmra.mrb[4].mxu0 %vm104_vm3, %v5316_v32  ;;  %v2464_v32 = vld [vmem:[%s7601_s2 + $0x48] sm:$0xff] }
 0x3e5   :  { %2750 = vmatprep.mubr.f32.mxu0 %v6275_v1 }
 0x4b7   :  { %v2436_v34 = vpop.f32.mrb[4].mxu0 }
 0x4b8   :  { %v2449_v35 = vadd.f32 %v2447_v33, %v2436_v34  ;;  %v2438_v37 = vpop.f32.mrb[5].mxu0  ;;  %v2482_v34 = vld [vmem:[%s7601_s2 + $0xd8] sm:$0xff] }
 0x4b9   :  { %v2450_v40 = vadd.f32 %v2447_v33, %v2438_v37  ;;  %v2481_v33 = vld [vmem:[%s7601_s2 + $0xd0] sm:$0xff] }
 0x4ba   :  { %v2451_v42 = vadd.f32 %v2449_v35, %v6603_v38  ;;  %v2488_v38 = vld [vmem:[%s7597_s14 + $0x8] sm:$0xff]  ;;  %v7027_v35 = vpack.c.bf16 %v2464_v32, %v2463_v31  ;;  %v7030_v37 = vpack.c.bf16 %v2482_v34, %v2481_v33  ;;  %v2667_v32 = vld [vmem:[%s7602_s10] sm:$0xff] }
 0x4bb   :  { %v2452_v43 = vadd.f32 %v2450_v40, %v6609_v41  ;;  %v3524_v41 = vld [vmem:[%s7598_s11] sm:$0xff]  ;;  %v2465_v40 = vld [vmem:[%s7601_s2 + $0x50] sm:$0xff] }
 0x4bc   :  { %v6873_v44 = vmax.f32 %v2451_v42, 0.0  ;;  %v2466_v42 = vld [vmem:[%s7601_s2 + $0x58] sm:$0xff] }
 0x4bd   :  { %v6875_v46 = vmax.f32 %v2452_v43, 0.0  ;;  %v2483_v43 = vld [vmem:[%s7601_s2 + $0xe0] sm:$0xff] }
 0x4be   :  { %2669 = vrot.lane.b32.xlu0 %v6873_v44, %s6277_s0 }
 0x4bf   :  { %2671 = vrot.lane.b32.xlu1 %v6875_v46, %s6277_s0  ;;  %2495 = vmatprep.subr.mxu1 %v6875_v46 }
 0x4c0   :  { %2496 = vmatpush1.msra.mxu1 %v6873_v44 }
 0x4c1   :  { %5318 = vmatmul.mubr.msk.f32.vlgmr.msra.gmra.mrb[2].mxu1 %vm104_vm3, %v2487_v47  ;;  %5920 = vmatprep.subr.bf16.mxu1 %v5919_v56  ;;  %v2484_v47 = vld [vmem:[%s7601_s2 + $0xe8] sm:$0xff] }
 0x4c2   :  { %2659 = vrot.lane.b32.xlu0 %v6873_v44, %s6276_s30  ;;  %2565 = vmatprep.mubr.f32.mxu1 %v6275_v1 }
 0x4c3   :  { %2661 = vrot.lane.b32.xlu1 %v6875_v46, %s6276_s30  ;;  %5922 = vmatpush3.bf16.msra.mxu1 %v6950_v60 }
 0x4c4   :  { %5924 = vmatprep.subr.bf16.mxu1 %v6959_v0 }
 0x4c5   :  { %5319 = vmatmul.mubr.msk.f32.gmra.mrb[4].mxu1 %vm104_vm3, %v2488_v38  ;;  %v7045_v38 = vpack.c.bf16 %v2466_v42, %v2465_v40 }
 0x4c6   :  { %2846 = vrot.lane.b32.xlu0 %v6873_v44, %s6278_s20 }
 0x4c7   :  { %2848 = vrot.lane.b32.xlu1 %v6875_v46, %s6278_s20  ;;  %5926 = vmatpush3.bf16.msra.mxu1 %v6968_v4 }
 0x4c8   :  { %5928 = vmatprep.subr.bf16.mxu1 %v6979_v13 }
 0x4ca   :  { %2944 = vrot.lane.b32.xlu0 %v6873_v44, %s6279_s21 }
 0x4cb   :  { %2946 = vrot.lane.b32.xlu1 %v6875_v46, %s6279_s21  ;;  %5930 = vmatpush3.bf16.msra.mxu1 %v6991_v21 }
 0x4cc   :  { %5932 = vmatprep.subr.bf16.mxu1 %v6994_v22 }
 0x4ce   :  { %3132 = vrot.lane.b32.xlu0 %v6873_v44, %s6280_s22 }
 0x4cf   :  { %3134 = vrot.lane.b32.xlu1 %v6875_v46, %s6280_s22  ;;  %5934 = vmatpush3.bf16.msra.mxu1 %v7009_v29 }
 0x4d0   :  { %5936 = vmatprep.subr.bf16.mxu1 %v7012_v30 }
 0x4d2   :  { %3230 = vrot.lane.b32.xlu0 %v6873_v44, %s6281_s1 }
 0x4d3   :  { %3232 = vrot.lane.b32.xlu1 %v6875_v46, %s6281_s1  ;;  %5938 = vmatpush3.bf16.msra.mxu1 %v7027_v35 }
 0x4d4   :  { %5940 = vmatprep.subr.bf16.mxu1 %v7030_v37 }
 0x4d6   :  { %3328 = vrot.lane.b32.xlu0 %v6873_v44, %s6282_s23 }
 0x4d7   :  { %3330 = vrot.lane.b32.xlu1 %v6875_v46, %s6282_s23  ;;  %5942 = vmatpush3.bf16.msra.mxu1 %v7045_v38 }
 0x4da   :  { %3426 = vrot.lane.b32.xlu0 %v6873_v44, %s7618_s4 }
 0x4db   :  { %3428 = vrot.lane.b32.xlu1 %v6875_v46, %s7618_s4 }
 0x4de   :  { %3528 = vperm.xlu0 %6273, %v3524_v41   ;;  %v7048_v41 = vpack.c.bf16 %v2484_v47, %v2483_v43  ;;  %v5327_v47 = vld [vmem:[%s7602_s10 + $0x28] sm:$0xff] }
 0x4df   :  { %3533 = vperm.xlu1 %6274, %v3525_v48   ;;  %v2467_v48 = vld [vmem:[%s7601_s2 + $0x60] sm:$0xff] }
 0x4e0   :  { %5944 = vmatprep.subr.bf16.mxu1 %v7048_v41 }
 0x4e2   :  { %2576 = vperm.xlu0 %6273, %v2572_v49   ;;  %v2468_v49 = vld [vmem:[%s7601_s2 + $0x68] sm:$0xff] }
 0x4e3   :  { %2581 = vperm.xlu1 %6274, %v2573_v50   ;;  %v2485_v50 = vld [vmem:[%s7601_s2 + $0xf0] sm:$0xff] }
 0x4e6   :  { %5149 = vperm.xlu0 %6273, %v5145_v51   ;;  %v2486_v51 = vld [vmem:[%s7601_s2 + $0xf8] sm:$0xff] }
 0x4e7   :  { %5154 = vperm.xlu1 %6274, %v5146_v53   ;;  %v7063_v53 = vpack.c.bf16 %v2468_v49, %v2467_v48  ;;  %v7066_v54 = vpack.c.bf16 %v2486_v51, %v2485_v50 }
 0x4e9   :  { %5946 = vmatpush3.bf16.msra.mxu1 %v7063_v53 }
 0x4ea   :  { %5948 = vmatprep.subr.bf16.mxu1 %v7066_v54 }
 0x4ed   :  { %5950 = vmatpush3.bf16.msra.mxu1 %v7076_v58 }
 0x4ee   :  { %5952 = vmatprep.subr.bf16.mxu1 %v5919_v56 }
 0x530   :  { %v2670_v62 = vpop.permute.xlu0 %2669 }
 0x531   :  { %v2672_v63 = vpop.permute.xlu1 %2671 }
 0x532   :  { %v2673_v2 = vsel %vm89_vm1, %v2670_v62, %v2672_v63  ;;  %v2674_v3 = vsel %vm89_vm1, %v2672_v63, %v2670_v62 }
 0x533   :  { %v2675_v5 = vmul.f32 %v2674_v3, %v6452_v16  ;;  %v2676_v9 = vmul.f32 %v2673_v2, %v6449_v15  ;;  %v5335_v3 = vld [vmem:[%s7602_s10 + $0x48] sm:$0xff] }
 0x534   :  { %v2660_v6 = vpop.permute.xlu0 %2659 }
 0x535   :  { %2686 = vmatprep.subr.mxu0 %v2676_v9  ;;  %v2662_v19 = vpop.permute.xlu1 %2661 }
 0x536   :  { %v2663_v56 = vsel %vm71_vm0, %v2660_v6, %v2662_v19  ;;  %v2664_v20 = vsel %vm71_vm0, %v2662_v19, %v2660_v6  ;;  %2687 = vmatpush1.msra.mxu0 %v2675_v5 }
 0x537   :  { %v2665_v24 = vmul.f32 %v2664_v20, %v6456_v18  ;;  %v2666_v16 = vmul.f32 %v2663_v56, %v6446_v14  ;;  %5322 = vmatmul.mubr.msk.f32.vlgmr.msra.gmra.mrb[6].mxu0 %vm104_vm3, %v5320_v17  ;;  %v5339_v56 = vld [vmem:[%s7602_s10 + $0x58] sm:$0xff] }
 0x538   :  { %v2847_v15 = vpop.permute.xlu0 %2846  ;;  %2756 = vmatprep.mubr.f32.mxu0 %v6275_v1 }
 0x539   :  { %2769 = vmatprep.subr.mxu0 %v2666_v16  ;;  %v2849_v10 = vpop.permute.xlu1 %2848 }
 0x53a   :  { %v2850_v26 = vsel %vm257_vm2, %v2847_v15, %v2849_v10  ;;  %2770 = vmatpush1.msra.mxu0 %v2665_v24  ;;  %v2851_v18 = vsel %vm257_vm2, %v2849_v10, %v2847_v15  ;;  %v5343_v10 = vld [vmem:[%s7602_s10 + $0x68] sm:$0xff] }
 0x53b   :  { %v2853_v14 = vmul.f32 %v2850_v26, %v6471_v28  ;;  %5323 = vmatmul.mubr.msk.f32.gmra.mrb[8].mxu0 %vm104_vm3, %v5321_v25  ;;  %v2852_v34 = vmul.f32 %v2851_v18, %v6484_v36  ;;  %v2668_v28 = vld [vmem:[%s7602_s10 + $0x8] sm:$0xff]  ;;  %v5326_v36 = vld [vmem:[%s7602_s10 + $0x20] sm:$0xff] }
 0x53c   :  { %v2945_v31 = vpop.permute.xlu0 %2944  ;;  %2833 = vmatprep.mubr.f32.mxu0 %v6275_v1  ;;  %v5350_v18 = vld [vmem:[%s7602_s10 + $0x80] sm:$0xff] }
 0x53d   :  { %2863 = vmatprep.subr.mxu0 %v2853_v14  ;;  %v2947_v33 = vpop.permute.xlu1 %2946 }
 0x53e   :  { %v2948_v40 = vsel %vm352_vm4, %v2945_v31, %v2947_v33  ;;  %v2949_v43 = vsel %vm352_vm4, %v2947_v33, %v2945_v31 }
 0x53f   :  { %v2951_v42 = vmul.f32 %v2948_v40, %v6490_v39  ;;  %5324 = vmatmul.mubr.msk.f32.vlgmr.msra.gmra.mrb[6].mxu0 %vm104_vm3, %v2667_v32  ;;  %v2950_v39 = vmul.f32 %v2949_v43, %v6501_v45  ;;  %v5330_v45 = vld [vmem:[%s7602_s10 + $0x30] sm:$0xff] }
 0x540   :  { %2864 = vmatpush1.msra.mxu0 %v2852_v34  ;;  %2839 = vmatprep.mubr.f32.mxu0 %v6275_v1  ;;  %v3133_v48 = vpop.permute.xlu0 %3132 }
 0x541   :  { %2961 = vmatprep.subr.mxu0 %v2951_v42  ;;  %v3135_v49 = vpop.permute.xlu1 %3134 }
 0x542   :  { %v3137_v50 = vsel %vm525_vm5, %v3135_v49, %v3133_v48  ;;  %v3136_v62 = vsel %vm525_vm5, %v3133_v48, %v3135_v49  ;;  %v5376_v48 = vld [vmem:[%s7603_s3 + $0xa0] sm:$0xff] }
 0x543   :  { %5325 = vmatmul.mubr.msk.f32.gmra.mrb[8].mxu0 %vm104_vm3, %v2668_v28  ;;  %v3139_v51 = vmul.f32 %v3137_v50, %v6516_v52  ;;  %v3138_v63 = vmul.f32 %v3136_v62, %v6529_v59  ;;  %v5377_v50 = vld [vmem:[%s7603_s3 + $0xa8] sm:$0xff]  ;;  %v5379_v62 = vld [vmem:[%s7603_s3 + $0xb8] sm:$0xff] }
 0x544   :  { %2927 = vmatprep.mubr.f32.mxu0 %v6275_v1  ;;  %v3231_v55 = vpop.permute.xlu0 %3230 }
 0x545   :  { %v3233_v57 = vpop.permute.xlu1 %3232 }
 0x546   :  { %v3235_v52 = vsel %vm620_vm6, %v3233_v57, %v3231_v55  ;;  %v3234_v6 = vsel %vm620_vm6, %v3231_v55, %v3233_v57  ;;  %v5378_v55 = vld [vmem:[%s7603_s3 + $0xb0] sm:$0xff] }
 0x547   :  { %5328 = vmatmul.mubr.msk.f32.vlgmr.msra.gmra.mrb[6].mxu0 %vm104_vm3, %v5326_v36  ;;  %v3237_v2 = vmul.f32 %v3235_v52, %v6535_v61  ;;  %v5338_v61 = vld [vmem:[%s7602_s10 + $0x50] sm:$0xff]  ;;  %v3236_v17 = vmul.f32 %v3234_v6, %v6548_v8  ;;  %v6035_v52 = vpack.c.bf16 %v5379_v62, %v5378_v55  ;;  %v5449_v55 = vld [vmem:[%s7603_s3 + $0x1f8] sm:$0xff] }
 0x548   :  { %2962 = vmatpush1.msra.mxu0 %v2950_v39  ;;  %2933 = vmatprep.mubr.f32.mxu0 %v6275_v1  ;;  %v3329_v5 = vpop.permute.xlu0 %3328  ;;  %v3617_v39 = vld [vmem:[%s7603_s3 + $0x20] sm:$0xff]  ;;  %v5366_v62 = vld [vmem:[%s7604_s12 + $0x10] sm:$0xff] }
 0x549   :  { %3051 = vmatprep.subr.mxu0 %v6875_v46  ;;  %v5331_v46 = vld [vmem:[%s7602_s10 + $0x38] sm:$0xff]  ;;  %v3331_v9 = vpop.permute.xlu1 %3330 }
 0x54a   :  { %v3333_v59 = vsel %vm715_vm7, %v3331_v9, %v3329_v5  ;;  %v3332_v16 = vsel %vm715_vm7, %v3329_v5, %v3331_v9  ;;  %v5401_v5 = vld [vmem:[%s7603_s3 + $0x108] sm:$0xff] }
 0x54b   :  { %5329 = vmatmul.mubr.msk.f32.gmra.mrb[8].mxu0 %vm104_vm3, %v5327_v47  ;;  %v3335_v19 = vmul.f32 %v3333_v59, %v6554_v12  ;;  %v5342_v12 = vld [vmem:[%s7602_s10 + $0x60] sm:$0xff]  ;;  %v3334_v15 = vmul.f32 %v3332_v16, %v6566_v11  ;;  %v5346_v11 = vld [vmem:[%s7602_s10 + $0x70] sm:$0xff]  ;;  %v3618_v47 = vld [vmem:[%s7603_s3 + $0x28] sm:$0xff] }
 0x54c   :  { %3025 = vmatprep.mubr.f32.mxu0 %v6275_v1  ;;  %v3427_v20 = vpop.permute.xlu0 %3426  ;;  %v5991_v49 = vpack.c.bf16 %v3618_v47, %v3617_v39  ;;  %v5444_v47 = vld [vmem:[%s7603_s3 + $0x1d0] sm:$0xff] }
 0x54d   :  { %v3429_v24 = vpop.permute.xlu1 %3428 }
 0x54e   :  { %v3431_v8 = vsel %vm810_vm8, %v3429_v24, %v3427_v20  ;;  %v3430_v26 = vsel %vm810_vm8, %v3427_v20, %v3429_v24 }
 0x54f   :  { %5332 = vmatmul.mubr.msk.f32.vlgmr.msra.gmra.mrb[6].mxu0 %vm104_vm3, %v5330_v45  ;;  %v3433_v25 = vmul.f32 %v6574_v23, %v3431_v8  ;;  %v3432_v23 = vmul.f32 %v6588_v27, %v3430_v26  ;;  %v5351_v27 = vld [vmem:[%s7602_s10 + $0x88] sm:$0xff]  ;;  %v6031_v45 = vpack.c.bf16 %v5377_v50, %v5376_v48  ;;  %v5403_v26 = vld [vmem:[%s7603_s3 + $0x118] sm:$0xff]  ;;  %v5446_v50 = vld [vmem:[%s7603_s3 + $0x1e0] sm:$0xff] }
 0x550   :  { %3052 = vmatpush1.msra.mxu0 %v6873_v44  ;;  %3031 = vmatprep.mubr.f32.mxu0 %v6275_v1  ;;  %v5334_v44 = vld [vmem:[%s7602_s10 + $0x40] sm:$0xff]  ;;  %v5445_v48 = vld [vmem:[%s7603_s3 + $0x1d8] sm:$0xff] }
 0x551   :  { %3149 = vmatprep.subr.mxu0 %v3139_v51  ;;  %v3619_v51 = vld [vmem:[%s7603_s3 + $0x30] sm:$0xff] }
 0x553   :  { %5333 = vmatmul.mubr.msk.f32.gmra.mrb[8].mxu0 %vm104_vm3, %v5331_v46  ;;  %v3620_v46 = vld [vmem:[%s7603_s3 + $0x38] sm:$0xff] }
 0x554   :  { %3115 = vmatprep.mubr.f32.mxu0 %v6275_v1  ;;  %v5995_v57 = vpack.c.bf16 %v3620_v46, %v3619_v51  ;;  %v5448_v46 = vld [vmem:[%s7603_s3 + $0x1f0] sm:$0xff] }
 0x557   :  { %5336 = vmatmul.mubr.msk.f32.vlgmr.msra.gmra.mrb[6].mxu0 %vm104_vm3, %v5334_v44  ;;  %v5356_v44 = vld [vmem:[%s7603_s3 + $0x40] sm:$0xff] }
 0x558   :  { %3150 = vmatpush1.msra.mxu0 %v3138_v63  ;;  %3121 = vmatprep.mubr.f32.mxu0 %v6275_v1  ;;  %v5357_v63 = vld [vmem:[%s7603_s3 + $0x48] sm:$0xff] }
 0x559   :  { %3247 = vmatprep.subr.mxu0 %v3237_v2  ;;  %v5400_v2 = vld [vmem:[%s7603_s3 + $0x100] sm:$0xff] }
 0x55a   :  { %v6063_v9 = vpack.c.bf16 %v5401_v5, %v5400_v2 }
 0x55b   :  { %5337 = vmatmul.mubr.msk.f32.gmra.mrb[8].mxu0 %vm104_vm3, %v5335_v3  ;;  %v5999_v3 = vpack.c.bf16 %v5357_v63, %v5356_v44 }
 0x55c   :  { %3213 = vmatprep.mubr.f32.mxu0 %v6275_v1 }
 0x55e   :  { %v3534_v8 = vpop.permute.xlu1 %3533 }
 0x55f   :  { %5340 = vmatmul.mubr.msk.f32.vlgmr.msra.gmra.mrb[6].mxu0 %vm104_vm3, %v5338_v61 }
 0x560   :  { %3248 = vmatpush1.msra.mxu0 %v3236_v17  ;;  %3219 = vmatprep.mubr.f32.mxu0 %v6275_v1  ;;  %v3529_v17 = vpop.permute.xlu0 %3528 }
 0x561   :  { %3345 = vmatprep.subr.mxu0 %v3335_v19 }
 0x563   :  { %5341 = vmatmul.mubr.msk.f32.gmra.mrb[8].mxu0 %vm104_vm3, %v5339_v56 }
 0x564   :  { %3311 = vmatprep.mubr.f32.mxu0 %v6275_v1 }
 0x567   :  { %5344 = vmatmul.mubr.msk.f32.vlgmr.msra.gmra.mrb[6].mxu0 %vm104_vm3, %v5342_v12  ;;  %v5358_v12 = vld [vmem:[%s7603_s3 + $0x50] sm:$0xff] }
 0x568   :  { %3346 = vmatpush1.msra.mxu0 %v3334_v15  ;;  %3317 = vmatprep.mubr.f32.mxu0 %v6275_v1 }
 0x569   :  { %3443 = vmatprep.subr.mxu0 %v3433_v25  ;;  %v5359_v25 = vld [vmem:[%s7603_s3 + $0x58] sm:$0xff] }
 0x56b   :  { %5345 = vmatmul.mubr.msk.f32.gmra.mrb[8].mxu0 %vm104_vm3, %v5343_v10  ;;  %v5402_v10 = vld [vmem:[%s7603_s3 + $0x110] sm:$0xff] }
 0x56c   :  { %3409 = vmatprep.mubr.f32.mxu0 %v6275_v1 }
 0x56f   :  { %5348 = vmatmul.mubr.msk.f32.vlgmr.msra.gmra.mrb[6].mxu0 %vm104_vm3, %v5346_v11 }
 0x570   :  { %3444 = vmatpush1.msra.mxu0 %v3432_v23  ;;  %3415 = vmatprep.mubr.f32.mxu0 %v6275_v1  ;;  %v5360_v23 = vld [vmem:[%s7603_s3 + $0x60] sm:$0xff] }
 0x573   :  { %5349 = vmatmul.mubr.msk.f32.gmra.mrb[8].mxu0 %vm104_vm3, %v5347_v7  ;;  %v6003_v7 = vpack.c.bf16 %v5359_v25, %v5358_v12  ;;  %v3704_v12 = vld [vmem:[%s7604_s12 + $0x8] sm:$0xff] }
 0x574   :  { %3507 = vmatprep.mubr.f32.mxu0 %v6275_v1 }
 0x577   :  { %5352 = vmatmul.mubr.msk.f32.vlgmr.msra.gmra.mrb[6].mxu0 %vm104_vm3, %v5350_v18  ;;  %v6067_v18 = vpack.c.bf16 %v5403_v26, %v5402_v10 }
 0x578   :  { %3513 = vmatprep.mubr.f32.mxu0 %v6275_v1  ;;  %v3613_v1 = vld [vmem:[%s7603_s3] sm:$0xff] }
 0x57b   :  { %5353 = vmatmul.mubr.msk.f32.gmra.mrb[8].mxu0 %vm104_vm3, %v5351_v27  ;;  %v5361_v27 = vld [vmem:[%s7603_s3 + $0x68] sm:$0xff] }
 0x594   :  { %v2561_v14 = vpop.f32.mrb[2].mxu1 }
 0x595   :  { %v2563_v31 = vpop.f32.mrb[3].mxu1 }
 0x596   :  { %2648 = vmatprep.mubr.f32.mxu1 %v2563_v31  ;;  %v5405_v31 = vld [vmem:[%s7603_s3 + $0x128] sm:$0xff] }
 0x597   :  { %2649 = vmatmul.mubr.f32.vlgmr.msra.gmra.mrb[6].mxu1 %v2561_v14  ;;  %v5404_v14 = vld [vmem:[%s7603_s3 + $0x120] sm:$0xff] }
 0x598   :  { %v2567_v32 = vpop.f32.mrb[4].mxu1  ;;  %5954 = vmatpush3.bf16.msra.mxu1 %v6950_v60  ;;  %v3614_v60 = vld [vmem:[%s7603_s3 + $0x8] sm:$0xff] }
 0x599   :  { %v2569_v33 = vpop.f32.mrb[5].mxu1  ;;  %5956 = vmatprep.subr.bf16.mxu1 %v6959_v0  ;;  %v5372_v0 = vld [vmem:[%s7603_s3 + $0x80] sm:$0xff] }
 0x59a   :  { %2653 = vmatprep.mubr.f32.mxu1 %v2569_v33  ;;  %v6071_v33 = vpack.c.bf16 %v5405_v31, %v5404_v14  ;;  %v5390_v31 = vld [vmem:[%s7603_s3 + $0xe0] sm:$0xff] }
 0x59b   :  { %2654 = vmatmul.mubr.f32.gmra.mrb[8].mxu1 %v2567_v32  ;;  %v6007_v32 = vpack.c.bf16 %v5361_v27, %v5360_v23  ;;  %v5383_v27 = vld [vmem:[%s7604_s12 + $0x28] sm:$0xff] }
 0x59c   :  { %5958 = vmatpush3.bf16.msra.mxu1 %v6968_v4  ;;  %v5983_v4 = vpack.c.bf16 %v3614_v60, %v3613_v1  ;;  %v5362_v1 = vld [vmem:[%s7603_s3 + $0x70] sm:$0xff]  ;;  %v5363_v60 = vld [vmem:[%s7603_s3 + $0x78] sm:$0xff] }
 0x59d   :  { %5960 = vmatprep.subr.bf16.mxu1 %v6979_v13  ;;  %v5373_v13 = vld [vmem:[%s7603_s3 + $0x88] sm:$0xff] }
 0x5a0   :  { %5962 = vmatpush3.bf16.msra.mxu1 %v6991_v21  ;;  %v6023_v21 = vpack.c.bf16 %v5373_v13, %v5372_v0  ;;  %v5406_v0 = vld [vmem:[%s7603_s3 + $0x130] sm:$0xff]  ;;  %v6011_v13 = vpack.c.bf16 %v5363_v60, %v5362_v1  ;;  %v5393_v60 = vld [vmem:[%s7603_s3 + $0xf8] sm:$0xff] }
 0x5a1   :  { %5964 = vmatprep.subr.bf16.mxu1 %v6994_v22  ;;  %v5374_v22 = vld [vmem:[%s7603_s3 + $0x90] sm:$0xff] }
 0x5a2   :  { %6024 = vmatprep.subr.bf16.mxu0 %v6023_v21  ;;  %v5392_v1 = vld [vmem:[%s7603_s3 + $0xf0] sm:$0xff] }
 0x5a3   :  { %6026 = vmatpush3.bf16.msra.mxu0 %v6023_v21 }
 0x5a4   :  { %5966 = vmatpush3.bf16.msra.mxu1 %v7009_v29  ;;  %v5375_v29 = vld [vmem:[%s7603_s3 + $0x98] sm:$0xff] }
 0x5a5   :  { %5968 = vmatprep.subr.bf16.mxu1 %v7012_v30  ;;  %v6027_v30 = vpack.c.bf16 %v5375_v29, %v5374_v22  ;;  %v5414_v22 = vld [vmem:[%s7603_s3 + $0x140] sm:$0xff]  ;;  %v5415_v29 = vld [vmem:[%s7603_s3 + $0x148] sm:$0xff] }
 0x5a7   :  { %6028 = vmatprep.subr.bf16.mxu0 %v6027_v30 }
 0x5a8   :  { %5970 = vmatpush3.bf16.msra.mxu1 %v7027_v35  ;;  %6030 = vmatpush3.bf16.msra.mxu0 %v6027_v30  ;;  %v3615_v35 = vld [vmem:[%s7603_s3 + $0x10] sm:$0xff]  ;;  %v6083_v30 = vpack.c.bf16 %v5415_v29, %v5414_v22 }
 0x5a9   :  { %5972 = vmatprep.subr.bf16.mxu1 %v7030_v37  ;;  %v3616_v37 = vld [vmem:[%s7603_s3 + $0x18] sm:$0xff]  ;;  %6032 = vmatprep.subr.bf16.mxu0 %v6031_v45  ;;  %v5396_v22 = vld [vmem:[%s7604_s12 + $0x30] sm:$0xff] }
 0x5ac   :  { %5974 = vmatpush3.bf16.msra.mxu1 %v7045_v38  ;;  %6034 = vmatpush3.bf16.msra.mxu0 %v6031_v45  ;;  %v5447_v45 = vld [vmem:[%s7603_s3 + $0x1e8] sm:$0xff] }
 0x5ad   :  { %5976 = vmatprep.subr.bf16.mxu1 %v7048_v41  ;;  %6036 = vmatprep.subr.bf16.mxu0 %v6035_v52  ;;  %v6131_v51 = vpack.c.bf16 %v5447_v45, %v5446_v50  ;;  %v5434_v50 = vld [vmem:[%s7603_s3 + $0x1b0] sm:$0xff]  ;;  %v5435_v45 = vld [vmem:[%s7603_s3 + $0x1b8] sm:$0xff] }
 0x5b0   :  { %5978 = vmatpush3.bf16.msra.mxu1 %v7063_v53  ;;  %v5987_v53 = vpack.c.bf16 %v3616_v37, %v3615_v35  ;;  %6038 = vmatpush3.bf16.msra.mxu0 %v6035_v52  ;;  %v5416_v35 = vld [vmem:[%s7603_s3 + $0x150] sm:$0xff]  ;;  %v5417_v37 = vld [vmem:[%s7603_s3 + $0x158] sm:$0xff] }
 0x5b1   :  { %5980 = vmatprep.subr.bf16.mxu1 %v7066_v54  ;;  %6064 = vmatprep.subr.bf16.mxu0 %v6063_v9 }
 0x5b4   :  { %5982 = vmatpush3.bf16.msra.mxu1 %v7076_v58 }
 0x5b5   :  { %5984 = vmatprep.subr.bf16.mxu1 %v5983_v4 }
 0x64a   :  { %v3509_v38 = vpop.f32.mrb[6].mxu0 }
 0x64b   :  { %v3511_v41 = vpop.f32.mrb[7].mxu0 }
 0x64c   :  { %3600 = vmatprep.mubr.f32.mxu1 %v3511_v41  ;;  %v5418_v41 = vld [vmem:[%s7603_s3 + $0x160] sm:$0xff] }
 0x64d   :  { %3601 = vmatmul.mubr.f32.vlgmr.msra.gmra.mrb[10].mxu1 %v3509_v38  ;;  %v6087_v38 = vpack.c.bf16 %v5417_v37, %v5416_v35  ;;  %v5397_v37 = vld [vmem:[%s7604_s12 + $0x38] sm:$0xff] }
 0x64e   :  { %v3515_v54 = vpop.f32.mrb[8].mxu0  ;;  %5986 = vmatpush3.bf16.msra.mxu1 %v5983_v4  ;;  %v5407_v4 = vld [vmem:[%s7603_s3 + $0x138] sm:$0xff] }
 0x64f   :  { %v3517_v58 = vpop.f32.mrb[9].mxu0  ;;  %5988 = vmatprep.subr.bf16.mxu1 %v5987_v53  ;;  %v6075_v21 = vpack.c.bf16 %v5407_v4, %v5406_v0  ;;  %v6055_v0 = vpack.c.bf16 %v5393_v60, %v5392_v1 }
 0x650   :  { %3605 = vmatprep.mubr.f32.mxu1 %v3517_v58  ;;  %v5420_v58 = vld [vmem:[%s7603_s3 + $0x170] sm:$0xff] }
 0x651   :  { %3606 = vmatmul.mubr.f32.gmra.mrb[12].mxu1 %v3515_v54 }
 0x652   :  { %5990 = vmatpush3.bf16.msra.mxu1 %v5987_v53  ;;  %v5419_v53 = vld [vmem:[%s7603_s3 + $0x168] sm:$0xff] }
 0x653   :  { %5992 = vmatprep.subr.bf16.mxu1 %v5991_v49  ;;  %v6091_v54 = vpack.c.bf16 %v5419_v53, %v5418_v41  ;;  %v5428_v41 = vld [vmem:[%s7603_s3 + $0x180] sm:$0xff]  ;;  %v5429_v53 = vld [vmem:[%s7603_s3 + $0x188] sm:$0xff] }
 0x656   :  { %5994 = vmatpush3.bf16.msra.mxu1 %v5991_v49  ;;  %v6127_v49 = vpack.c.bf16 %v5445_v48, %v5444_v47  ;;  %v5432_v47 = vld [vmem:[%s7603_s3 + $0x1a0] sm:$0xff]  ;;  %v5433_v48 = vld [vmem:[%s7603_s3 + $0x1a8] sm:$0xff] }
 0x657   :  { %5996 = vmatprep.subr.bf16.mxu1 %v5995_v57 }
 0x65a   :  { %5998 = vmatpush3.bf16.msra.mxu1 %v5995_v57  ;;  %v6135_v57 = vpack.c.bf16 %v5449_v55, %v5448_v46  ;;  %v5438_v46 = vld [vmem:[%s7604_s12 + $0x60] sm:$0xff] }
 0x65b   :  { %6000 = vmatprep.subr.bf16.mxu1 %v5999_v3 }
 0x66a   :  { %v5504_v34 = vpop.f32.mrb[6].mxu1 }
 0x66b   :  { %v5505_v40 = vpop.f32.mrb[7].mxu1 }
 0x66c   :  { %v7257_v42 = vadd.f32 %v5505_v40, %v5504_v34  ;;  %v5421_v34 = vld [vmem:[%s7603_s3 + $0x178] sm:$0xff] }
 0x66d   :  { %v6095_v40 = vpack.c.bf16 %v5421_v34, %v5420_v58  ;;  %v5424_v58 = vld [vmem:[%s7604_s12 + $0x50] sm:$0xff]  ;;  %v6103_v34 = vpack.c.bf16 %v5429_v53, %v5428_v41 }
 0x66e   :  { %v5507_v28 = vpop.f32.mrb[8].mxu1 }
 0x66f   :  { %v5508_v43 = vpop.f32.mrb[9].mxu1 }
 0x670   :  { %v7259_v36 = vadd.f32 %v5508_v43, %v5507_v28  ;;  %v5442_v28 = vld [vmem:[%s7603_s3 + $0x1c0] sm:$0xff]  ;;  %v5443_v43 = vld [vmem:[%s7603_s3 + $0x1c8] sm:$0xff] }
 0x671   :  { %v6123_v39 = vpack.c.bf16 %v5443_v43, %v5442_v28  ;;  %v5431_v28 = vld [vmem:[%s7603_s3 + $0x198] sm:$0xff] }
 0x672   :  { %v5425_v43 = vld [vmem:[%s7604_s12 + $0x58] sm:$0xff] }
 0x720   :  { %v5542_v6 = vpop.f32.mrb[10].mxu1 }
 0x721   :  { %v5543_v59 = vpop.f32.mrb[11].mxu1 }
 0x722   :  { %v5544_v61 = vadd.f32 %v5543_v59, %v5542_v6 }
 0x724   :  { %v3603_v19 = vadd.f32 %v5544_v61, %v3529_v17  ;;  %v5545_v56 = vpop.f32.mrb[12].mxu1 }
 0x725   :  { %v5546_v20 = vpop.f32.mrb[13].mxu1 }
 0x726   :  { %v7297_v24 = vmax.f32 %v3603_v19, 0.0  ;;  %v5547_v16 = vadd.f32 %v5546_v20, %v5545_v56  ;;  %v5367_v56 = vld [vmem:[%s7604_s12 + $0x18] sm:$0xff]  ;;  %v3703_v20 = vld [vmem:[%s7604_s12] sm:$0xff] }
 0x728   :  { %v3608_v15 = vadd.f32 %v5547_v16, %v3534_v8  ;;  %5694 = vmatprep.mubr.msk.f32.mxu1 %vm3621_vm9, %v7297_v24  ;;  %5746 = vmatprep.mubr.msk.f32.mxu0 %vm3621_vm9, %v7297_v24  ;;  %v5386_v16 = vld [vmem:[%s7603_s3 + $0xc0] sm:$0xff]  ;;  %v5387_v8 = vld [vmem:[%s7603_s3 + $0xc8] sm:$0xff] }
 0x729   :  { %v6043_v25 = vpack.c.bf16 %v5387_v8, %v5386_v16 }
 0x72a   :  { %v7315_v11 = vmax.f32 %v3608_v15, 0.0  ;;  %v5382_v15 = vld [vmem:[%s7604_s12 + $0x20] sm:$0xff] }
 0x72c   :  { %5695 = vmatmul.mubr.msk.f32.vlgmr.msra.gmra.mrb[14].mxu1 %vm3621_vm9, %v7315_v11  ;;  %5747 = vmatmul.mubr.msk.f32.vlgmr.msra.gmra.mrb[10].mxu0 %vm3621_vm9, %v7315_v11 }
 0x72d   :  { %6002 = vmatpush3.bf16.msra.mxu1 %v5999_v3  ;;  %6066 = vmatpush3.bf16.msra.mxu0 %v6063_v9 }
 0x72e   :  { %5713 = vmatprep.mubr.msk.f32.mxu1 %vm3621_vm9, %v7297_v24  ;;  %5798 = vmatprep.mubr.msk.f32.mxu0 %vm3621_vm9, %v7297_v24 }
 0x72f   :  { %6004 = vmatprep.subr.bf16.mxu1 %v6003_v7  ;;  %6068 = vmatprep.subr.bf16.mxu0 %v6067_v18 }
 0x731   :  { %6006 = vmatpush3.bf16.msra.mxu1 %v6003_v7  ;;  %6070 = vmatpush3.bf16.msra.mxu0 %v6067_v18  ;;  %v5388_v7 = vld [vmem:[%s7603_s3 + $0xd0] sm:$0xff]  ;;  %v5389_v18 = vld [vmem:[%s7603_s3 + $0xd8] sm:$0xff] }
 0x732   :  { %6008 = vmatprep.subr.bf16.mxu1 %v6007_v32  ;;  %6072 = vmatprep.subr.bf16.mxu0 %v6071_v33  ;;  %v6047_v14 = vpack.c.bf16 %v5389_v18, %v5388_v7 }
 0x735   :  { %6010 = vmatpush3.bf16.msra.mxu1 %v6007_v32  ;;  %6074 = vmatpush3.bf16.msra.mxu0 %v6071_v33  ;;  %v5391_v32 = vld [vmem:[%s7603_s3 + $0xe8] sm:$0xff] }
 0x736   :  { %6012 = vmatprep.subr.bf16.mxu1 %v6011_v13  ;;  %6076 = vmatprep.subr.bf16.mxu0 %v6075_v21  ;;  %v6051_v33 = vpack.c.bf16 %v5391_v32, %v5390_v31 }
 0x739   :  { %6014 = vmatpush3.bf16.msra.mxu1 %v6011_v13  ;;  %6078 = vmatpush3.bf16.msra.mxu0 %v6075_v21 }
 0x73a   :  { %6084 = vmatprep.subr.bf16.mxu0 %v6083_v30 }
 0x73c   :  { %5714 = vmatmul.mubr.msk.f32.vlgmr.msra.gmra.mrb[16].mxu1 %vm3621_vm9, %v7315_v11  ;;  %5799 = vmatmul.mubr.msk.f32.vlgmr.msra.gmra.mrb[12].mxu0 %vm3621_vm9, %v7315_v11 }
 0x73d   :  { %6086 = vmatpush3.bf16.msra.mxu0 %v6083_v30  ;;  %5824 = vmatprep.mubr.msk.f32.mxu0 %vm3621_vm9, %v7297_v24 }
 0x73e   :  { %6088 = vmatprep.subr.bf16.mxu0 %v6087_v38  ;;  %5720 = vmatprep.mubr.msk.f32.mxu1 %vm3792_vm10, %v5366_v62 }
 0x741   :  { %6090 = vmatpush3.bf16.msra.mxu0 %v6087_v38  ;;  %v5410_v38 = vld [vmem:[%s7604_s12 + $0x40] sm:$0xff] }
 0x742   :  { %6092 = vmatprep.subr.bf16.mxu0 %v6091_v54 }
 0x745   :  { %6094 = vmatpush3.bf16.msra.mxu0 %v6091_v54  ;;  %v5411_v54 = vld [vmem:[%s7604_s12 + $0x48] sm:$0xff] }
 0x746   :  { %6096 = vmatprep.subr.bf16.mxu0 %v6095_v40 }
 0x749   :  { %6098 = vmatpush3.bf16.msra.mxu0 %v6095_v40  ;;  %v5430_v40 = vld [vmem:[%s7603_s3 + $0x190] sm:$0xff] }
 0x74a   :  { %6124 = vmatprep.subr.bf16.mxu0 %v6123_v39 }
 0x74c   :  { %5825 = vmatmul.mubr.msk.f32.vlgmr.msra.gmra.mrb[14].mxu0 %vm3621_vm9, %v7315_v11 }
 0x74d   :  { %6126 = vmatpush3.bf16.msra.mxu0 %v6123_v39  ;;  %5876 = vmatprep.mubr.msk.f32.mxu0 %vm3621_vm9, %v7297_v24  ;;  %v6107_v39 = vpack.c.bf16 %v5431_v28, %v5430_v40 }
 0x74e   :  { %6128 = vmatprep.subr.bf16.mxu0 %v6127_v49 }
 0x751   :  { %6130 = vmatpush3.bf16.msra.mxu0 %v6127_v49  ;;  %v6111_v49 = vpack.c.bf16 %v5433_v48, %v5432_v47 }
 0x752   :  { %6132 = vmatprep.subr.bf16.mxu0 %v6131_v51 }
 0x755   :  { %6134 = vmatpush3.bf16.msra.mxu0 %v6131_v51  ;;  %v6115_v51 = vpack.c.bf16 %v5435_v45, %v5434_v50 }
 0x756   :  { %6136 = vmatprep.subr.bf16.mxu0 %v6135_v57 }
 0x759   :  { %6138 = vmatpush3.bf16.msra.mxu0 %v6135_v57 }
 0x75c   :  { %5877 = vmatmul.mubr.msk.f32.vlgmr.msra.gmra.mrb[16].mxu0 %vm3621_vm9, %v7315_v11 }
 0x7ff   :  { %v5696_v52 = vpop.f32.mrb[14].mxu1  ;;  %v5748_v44 = vpop.f32.mrb[10].mxu0 }
 0x800   :  { %v3694_v63 = vpop.f32.mrb[15].mxu1  ;;  %v4030_v2 = vpop.f32.mrb[11].mxu0 }
 0x801   :  { %v6019_v3 = vpack.c.bf16 %v5696_v52, %v3694_v63  ;;  %v6039_v5 = vpack.c.bf16 %v5748_v44, %v4030_v2  ;;  %v5456_v52 = vld [vmem:[%s7603_s3 + $0x200] sm:$0xff]  ;;  %v5457_v44 = vld [vmem:[%s7603_s3 + $0x208] sm:$0xff]  ;;  %v5452_v2 = vld [vmem:[%s7604_s12 + $0x70] sm:$0xff] }
 0x802   :  { %v5439_v63 = vld [vmem:[%s7604_s12 + $0x68] sm:$0xff] }
 0x80f   :  { %v5715_v9 = vpop.f32.mrb[16].mxu1  ;;  %v5800_v6 = vpop.f32.mrb[12].mxu0 }
 0x810   :  { %v3780_v59 = vpop.f32.mrb[17].mxu1  ;;  %v4370_v61 = vpop.f32.mrb[13].mxu0 }
 0x811   :  { %v6015_v17 = vpack.c.bf16 %v5715_v9, %v3780_v59  ;;  %v6079_v19 = vpack.c.bf16 %v5800_v6, %v4370_v61  ;;  %v5459_v9 = vld [vmem:[%s7603_s3 + $0x218] sm:$0xff]  ;;  %v5460_v61 = vld [vmem:[%s7603_s3 + $0x220] sm:$0xff] }
 0x812   :  { %v5453_v6 = vld [vmem:[%s7604_s12 + $0x78] sm:$0xff] }
 0x813   :  { %6016 = vmatprep.subr.bf16.mxu1 %v6015_v17 }
 0x814   :  { %6018 = vmatpush3.bf16.msra.mxu1 %v6015_v17  ;;  %v5461_v17 = vld [vmem:[%s7603_s3 + $0x228] sm:$0xff] }
 0x815   :  { %6020 = vmatprep.subr.bf16.mxu1 %v6019_v3 }
 0x817   :  { %5721 = vmatmul.mubr.msk.f32.vlgmr.msra.gmra.mrb[18].mxu1 %vm3792_vm10, %v5367_v56  ;;  %v5462_v56 = vld [vmem:[%s7603_s3 + $0x230] sm:$0xff] }
 0x818   :  { %6022 = vmatpush3.bf16.msra.mxu1 %v6019_v3  ;;  %5727 = vmatprep.mubr.msk.f32.mxu1 %vm3792_vm10, %v3703_v20  ;;  %v6143_v3 = vpack.c.bf16 %v5457_v44, %v5456_v52  ;;  %v5463_v20 = vld [vmem:[%s7603_s3 + $0x238] sm:$0xff] }
 0x819   :  { %6040 = vmatprep.subr.bf16.mxu1 %v6039_v5  ;;  %v6155_v16 = vpack.c.bf16 %v5463_v20, %v5462_v56 }
 0x81f   :  { %5728 = vmatmul.mubr.msk.f32.vlgmr.msra.gmra.mrb[18].mxu1 %vm3792_vm10, %v3704_v12  ;;  %v5826_v10 = vpop.f32.mrb[14].mxu0 }
 0x820   :  { %6042 = vmatpush3.bf16.msra.mxu1 %v6039_v5  ;;  %v4540_v26 = vpop.f32.mrb[15].mxu0  ;;  %5753 = vmatprep.mubr.msk.f32.mxu1 %vm3792_vm10, %v5382_v15  ;;  %v5458_v5 = vld [vmem:[%s7603_s3 + $0x210] sm:$0xff] }
 0x821   :  { %v6099_v23 = vpack.c.bf16 %v5826_v10, %v4540_v26  ;;  %6044 = vmatprep.subr.bf16.mxu1 %v6043_v25  ;;  %v6147_v59 = vpack.c.bf16 %v5459_v9, %v5458_v5  ;;  %v2582_v10 = vpop.permute.xlu1 %2581  ;;  %v2577_v26 = vpop.permute.xlu0 %2576 }
 0x822   :  { %v2656_v18 = vadd.f32 %v7259_v36, %v2582_v10  ;;  %v2651_v31 = vadd.f32 %v7257_v42, %v2577_v26 }
 0x825   :  { %v5150_v7 = vpop.permute.xlu0 %5149 }
 0x827   :  { %5754 = vmatmul.mubr.msk.f32.vlgmr.msra.gmra.mrb[18].mxu1 %vm3792_vm10, %v5383_v27 }
 0x828   :  { %6046 = vmatpush3.bf16.msra.mxu1 %v6043_v25  ;;  %5772 = vmatprep.mubr.msk.f32.mxu1 %vm3621_vm9, %v7297_v24  ;;  %v5467_v25 = vld [vmem:[%s7604_s12 + $0x88] sm:$0xff] }
 0x829   :  { %6048 = vmatprep.subr.bf16.mxu1 %v6047_v14 }
 0x82c   :  { %6050 = vmatpush3.bf16.msra.mxu1 %v6047_v14 }
 0x82d   :  { %6052 = vmatprep.subr.bf16.mxu1 %v6051_v33 }
 0x82f   :  { %v5878_v4 = vpop.f32.mrb[16].mxu0 }
 0x830   :  { %6054 = vmatpush3.bf16.msra.mxu1 %v6051_v33  ;;  %v4880_v13 = vpop.f32.mrb[17].mxu0 }
 0x831   :  { %v6139_v21 = vpack.c.bf16 %v5878_v4, %v4880_v13  ;;  %6056 = vmatprep.subr.bf16.mxu1 %v6055_v0 }
 0x834   :  { %6058 = vmatpush3.bf16.msra.mxu1 %v6055_v0 }
 0x837   :  { %5773 = vmatmul.mubr.msk.f32.vlgmr.msra.gmra.mrb[20].mxu1 %vm3621_vm9, %v7315_v11 }
 0x838   :  { %5779 = vmatprep.mubr.msk.f32.mxu1 %vm3792_vm10, %v5396_v22 }
 0x90a   :  { %v5774_v29 = vpop.f32.mrb[20].mxu1 }
 0x90b   :  { %v4200_v30 = vpop.f32.mrb[21].mxu1 }
 0x90c   :  { %v6059_v35 = vpack.c.bf16 %v5774_v29, %v4200_v30 }
 0x90e   :  { %6060 = vmatprep.subr.bf16.mxu1 %v6059_v35 }
 0x90f   :  { %6062 = vmatpush3.bf16.msra.mxu1 %v6059_v35  ;;  %v5173_v35 = vld [vmem:[%s7605_s16 + $0x8] sm:$0x3] }
 0x910   :  { %6080 = vmatprep.subr.bf16.mxu1 %v6079_v19 }
 0x912   :  { %5780 = vmatmul.mubr.msk.f32.vlgmr.msra.gmra.mrb[18].mxu1 %vm3792_vm10, %v5397_v37  ;;  %v5175_v37 = vld [vmem:[%s7606_s17 + $0x8] sm:$0x3] }
 0x913   :  { %6082 = vmatpush3.bf16.msra.mxu1 %v6079_v19  ;;  %5805 = vmatprep.mubr.msk.f32.mxu1 %vm3792_vm10, %v5410_v38  ;;  %v6151_v19 = vpack.c.bf16 %v5461_v17, %v5460_v61  ;;  %v5174_v38 = vld [vmem:[%s7606_s17] sm:$0xff] }
 0x914   :  { %6100 = vmatprep.subr.bf16.mxu1 %v6099_v23 }
 0x91a   :  { %5806 = vmatmul.mubr.msk.f32.vlgmr.msra.gmra.mrb[18].mxu1 %vm3792_vm10, %v5411_v54 }
 0x91b   :  { %6102 = vmatpush3.bf16.msra.mxu1 %v6099_v23  ;;  %5831 = vmatprep.mubr.msk.f32.mxu1 %vm3792_vm10, %v5424_v58 }
 0x91c   :  { %6104 = vmatprep.subr.bf16.mxu1 %v6103_v34 }
 0x922   :  { %5832 = vmatmul.mubr.msk.f32.vlgmr.msra.gmra.mrb[18].mxu1 %vm3792_vm10, %v5425_v43 }
 0x923   :  { %6106 = vmatpush3.bf16.msra.mxu1 %v6103_v34  ;;  %5850 = vmatprep.mubr.msk.f32.mxu1 %vm3621_vm9, %v7297_v24 }
 0x924   :  { %6108 = vmatprep.subr.bf16.mxu1 %v6107_v39 }
 0x927   :  { %6110 = vmatpush3.bf16.msra.mxu1 %v6107_v39 }
 0x928   :  { %6112 = vmatprep.subr.bf16.mxu1 %v6111_v49 }
 0x92b   :  { %6114 = vmatpush3.bf16.msra.mxu1 %v6111_v49 }
 0x92c   :  { %6116 = vmatprep.subr.bf16.mxu1 %v6115_v51 }
 0x92f   :  { %6118 = vmatpush3.bf16.msra.mxu1 %v6115_v51 }
 0x932   :  { %5851 = vmatmul.mubr.msk.f32.vlgmr.msra.gmra.mrb[22].mxu1 %vm3621_vm9, %v7315_v11 }
 0x933   :  { %5857 = vmatprep.mubr.msk.f32.mxu1 %vm3792_vm10, %v5438_v46 }
 0xa05   :  { %v5852_v55 = vpop.f32.mrb[22].mxu1 }
 0xa06   :  { %v4710_v57 = vpop.f32.mrb[23].mxu1 }
 0xa07   :  { %v6119_v62 = vpack.c.bf16 %v5852_v55, %v4710_v57 }
 0xa09   :  { %6120 = vmatprep.subr.bf16.mxu1 %v6119_v62 }
 0xa0a   :  { %6122 = vmatpush3.bf16.msra.mxu1 %v6119_v62 }
 0xa0b   :  { %6140 = vmatprep.subr.bf16.mxu1 %v6139_v21 }
 0xa0d   :  { %5858 = vmatmul.mubr.msk.f32.vlgmr.msra.gmra.mrb[18].mxu1 %vm3792_vm10, %v5439_v63 }
 0xa0e   :  { %6142 = vmatpush3.bf16.msra.mxu1 %v6139_v21  ;;  %5883 = vmatprep.mubr.msk.f32.mxu1 %vm3792_vm10, %v5452_v2  ;;  %v5172_v21 = vld [vmem:[%s7605_s16] sm:$0xff] }
 0xa0f   :  { %6144 = vmatprep.subr.bf16.mxu1 %v6143_v3  ;;  %5916 = vmatprep.mubr.msk.f32.mxu0 %vm3792_vm10, %v5172_v21 }
 0xa15   :  { %5884 = vmatmul.mubr.msk.f32.vlgmr.msra.gmra.mrb[18].mxu1 %vm3792_vm10, %v5453_v6 }
 0xa16   :  { %6146 = vmatpush3.bf16.msra.mxu1 %v6143_v3  ;;  %5902 = vmatprep.mubr.msk.f32.mxu1 %vm3621_vm9, %v7297_v24  ;;  %v5466_v24 = vld [vmem:[%s7604_s12 + $0x80] sm:$0xff] }
 0xa17   :  { %6148 = vmatprep.subr.bf16.mxu1 %v6147_v59 }
 0xa1a   :  { %6150 = vmatpush3.bf16.msra.mxu1 %v6147_v59 }
 0xa1b   :  { %6152 = vmatprep.subr.bf16.mxu1 %v6151_v19 }
 0xa1e   :  { %6154 = vmatpush3.bf16.msra.mxu1 %v6151_v19 }
 0xa1f   :  { %6156 = vmatprep.subr.bf16.mxu1 %v6155_v16 }
 0xa22   :  { %6158 = vmatpush3.bf16.msra.mxu1 %v6155_v16 }
 0xa25   :  { %5903 = vmatmul.mubr.msk.f32.vlgmr.msra.gmra.mrb[24].mxu1 %vm3621_vm9, %v7315_v11  ;;  %v5155_v11 = vpop.permute.xlu1 %5154 }
 0xa26   :  { %5909 = vmatprep.mubr.msk.f32.mxu1 %vm3792_vm10, %v5466_v24 }
 0xaf8   :  { %v5904_v8 = vpop.f32.mrb[24].mxu1 }
 0xaf9   :  { %v5050_v12 = vpop.f32.mrb[25].mxu1 }
 0xafa   :  { %v6159_v15 = vpack.c.bf16 %v5904_v8, %v5050_v12 }
 0xafc   :  { %6160 = vmatprep.subr.bf16.mxu1 %v6159_v15 }
 0xafd   :  { %6162 = vmatpush3.bf16.msra.mxu1 %v6159_v15 }
 0xb00   :  { %5910 = vmatmul.mubr.msk.f32.vlgmr.msra.gmra.mrb[18].mxu1 %vm3792_vm10, %v5467_v25 }
 0xbd3   :  { %v5911_v23 = vpop.f32.mrb[18].mxu1 }
 0xbd4   :  { %v5158_v27 = vadd.f32 %v5911_v23, %v5155_v11  ;;  %v5134_v14 = vpop.f32.mrb[19].mxu1 }
 0xbd5   :  { %v5157_v32 = vadd.f32 %v5150_v7, %v5134_v14 }
 0xbd6   :  { %v5160_v33 = vadd.f32 %v5158_v27, %v2656_v18 }
 0xbd7   :  { %v5159_v1 = vadd.f32 %v5157_v32, %v2651_v31 }
 0xbd8   :  { %v5162_v60 = vmax.f32 %v5160_v33, 0.0 }
 0xbd9   :  { %v5161_v0 = vmax.f32 %v5159_v1, 0.0 }
 0xbda   :  { %v5166_v4 = vsel %vm3621_vm9, %v5162_v60, 0.0 }
 0xbdb   :  { %5167 = vadd.xlane.f32.xlu1 %v5166_v4  ;;  %v5163_v13 = vsel %vm3621_vm9, %v5161_v0, 0.0 }
 0xbdc   :  { %5164 = vadd.xlane.f32.xlu0 %v5163_v13 }
 0xc68   :  { %v5168_v36 = vpop.xlane.xlu1 %5167 }
 0xc69   :  { %v5171_v22 = vmul.f32 0.015625, %v5168_v36  ;;  %v5165_v42 = vpop.xlane.xlu0 %5164 }
 0xc6a   :  { %v5170_v29 = vmul.f32 0.015625, %v5165_v42 }
 0xc6c   :  { %v6163_v30 = vpack.c.bf16 %v5171_v22, %v5170_v29 }
 0xc6e   :  { %6164 = vmatprep.subr.bf16.mxu0 %v6163_v30 }
 0xc6f   :  { %6166 = vmatpush3.bf16.msra.mxu0 %v6163_v30 }
 0xc72   :  { %5917 = vmatmul.mubr.msk.f32.vlgmr.msra.gmra.mrb[18].mxu0 %vm3792_vm10, %v5173_v35 }
 0xd45   :  { %v5918_v41 = vpop.f32.mrb[18].mxu0 }
 0xd46   :  { %v5254_v53 = vadd.f32 %v5918_v41, %v5175_v37  ;;  %v5248_v54 = vpop.f32.mrb[19].mxu0 }
 0xd47   :  { %v5249_v58 = vadd.f32 %v5248_v54, %v5174_v38 }
 0xd48   :  { %5260 = vst.msk [vmem:[%s7607_s18 + $0x8] sm:$0x3] %vm5259_vm11, %v5254_v53 }
 0xd49   :  { %5258 = vst.msk [vmem:[%s7607_s18] sm:$0xff] %vm5257_vm12, %v5249_v58 }

</bundles_post_ra>
